<compile_context>
chip_gen: v7x
topology: tpu7x:2x2x1
jax: 0.10.0
libtpu: 0.0.40
codegen_flags: <defaults>
</compile_context>

<pallas_src>
import math

import jax
import jax.numpy as jnp
from jax import lax
from jax.experimental import pallas as pl
from jax.experimental.pallas import tpu as pltpu


# ----------------------------- small helpers -------------------------------

def _elu(x):
    # ELU with alpha=1 (matches torch.nn.ELU default); exp arg clamped <= 0.
    return jnp.where(x > 0, x, jnp.exp(jnp.minimum(x, 0.0)) - 1.0)


def _sigmoid(x):
    # Numerically stable sigmoid with an exact divide (GLU gates).
    z = jnp.exp(-jnp.abs(x))
    return jnp.where(x >= 0, 1.0 / (1.0 + z), z / (1.0 + z))


def _causal_taps(KH, KW, capture_center=False):
    """Kernel taps allowed by the PixelCNN causal mask (mask type A when
    capture_center=False)."""
    ci, cj = KH // 2, KW // 2
    taps = []
    for i in range(KH):
        for j in range(KW):
            if i < ci or (i == ci and (j < cj or (j == cj and capture_center))):
                taps.append((i, j))
    return taps


def _choose_bblk(B, HW, target_m=1024, min_parallel=2):
    # Largest divisor of B such that bblk*H*W <= target_m, while keeping at
    # least `min_parallel` parallel grid steps (v7x has 2 TensorCores).
    cap = max(1, target_m // max(HW, 1))
    if B >= min_parallel:
        cap = min(cap, B // min_parallel)
    cap = max(1, min(cap, B))
    for d in range(cap, 0, -1):
        if B % d == 0:
            return d
    return 1


def _const_index_map(ndim):
    return lambda b: (0,) * ndim


def _repeat_index_map(ndim):
    # Weight stacked on a leading repeat axis: block r, rest constant.
    return lambda b, r: (r,) + (0,) * (ndim - 1)


# ------------------- fused causal backbone (all repeats) --------------------
# grid = (B // bblk, num_repeats); batch axis "parallel", repeat axis
# "arbitrary".  The activation is carried in the resident output block.

def _make_backbone_kernel(Bblk, H, W, Cin, Chid, taps, ph, pw):
    M = Bblk * H * W

    def kernel(x_ref, w1_ref, b1_ref, w2v_ref, b2v_ref, w2g_ref, b2g_ref,
               o_ref, pad1, pad2):
        r = pl.program_id(1)

        @pl.when(r == 0)
        def _init():
            # Zero only the padding halo (top rows + left/right columns); the
            # interior is rewritten before every read, and the bottom padding
            # rows are never read by a causal (mask-A) conv, so the scratch
            # buffers omit them entirely.  Runs once per batch block, so it is
            # safe under "parallel" megacore sharding of the batch axis.
            if ph > 0:
                pad1[:, :ph, :, :] = jnp.zeros(
                    (Bblk, ph, W + 2 * pw, Cin), jnp.float32)
                pad2[:, :ph, :, :] = jnp.zeros(
                    (Bblk, ph, W + 2 * pw, Chid), jnp.float32)
            if pw > 0:
                pad1[:, ph:, :pw, :] = jnp.zeros((Bblk, H, pw, Cin),
                                                 jnp.float32)
                pad1[:, ph:, pw + W:, :] = jnp.zeros((Bblk, H, pw, Cin),
                                                     jnp.float32)
                pad2[:, ph:, :pw, :] = jnp.zeros((Bblk, H, pw, Chid),
                                                 jnp.float32)
                pad2[:, ph:, pw + W:, :] = jnp.zeros((Bblk, H, pw, Chid),
                                                     jnp.float32)
            # Seed the carried activation with the input block.
            o_ref[...] = x_ref[...]

        state = o_ref[...]                                 # (Bblk,H,W,Cin) f32
        a = _elu(state)
        pad1[:, ph:ph + H, pw:pw + W, :] = a

        # Causal conv 1: per-tap matmul accumulation (no im2col concat).
        h = None
        for t, (i, j) in enumerate(taps):
            patch = pad1[:, i:i + H, j:j + W, :].reshape(M, Cin)
            contrib = jnp.dot(patch.astype(jnp.bfloat16), w1_ref[0, t],
                              preferred_element_type=jnp.float32)
            h = contrib if h is None else h + contrib
        h = _elu(h + b1_ref[0])                            # dropout: identity
        pad2[:, ph:ph + H, pw:pw + W, :] = h.reshape(Bblk, H, W, Chid)

        # Causal conv 2, GLU with pre-split value/gate weights.
        val = None
        gate = None
        for t, (i, j) in enumerate(taps):
            patch = pad2[:, i:i + H, j:j + W, :].reshape(M, Chid)
            pb = patch.astype(jnp.bfloat16)
            cv = jnp.dot(pb, w2v_ref[0, t], preferred_element_type=jnp.float32)
            cg = jnp.dot(pb, w2g_ref[0, t], preferred_element_type=jnp.float32)
            val = cv if val is None else val + cv
            gate = cg if gate is None else gate + cg
        y = (val + b2v_ref[0]) * _sigmoid(gate + b2g_ref[0])
        o_ref[...] = state + y.reshape(Bblk, H, W, Cin)

    return kernel


def causal_backbone(x_bhwc, w1_all, b1_all, w2v_all, b2v_all, w2g_all, b2g_all,
                    taps, ph, pw, bblk):
    B, H, W, Cin = x_bhwc.shape
    R = w1_all.shape[0]
    Chid = w1_all.shape[-1]
    kernel = _make_backbone_kernel(bblk, H, W, Cin, Chid, taps, ph, pw)
    weight_args = [w1_all, b1_all, w2v_all, b2v_all, w2g_all, b2g_all]
    return pl.pallas_call(
        kernel,
        out_shape=jax.ShapeDtypeStruct((B, H, W, Cin), jnp.float32),
        grid_spec=pltpu.PrefetchScalarGridSpec(
            num_scalar_prefetch=0,
            grid=(B // bblk, R),
            in_specs=[pl.BlockSpec((bblk, H, W, Cin),
                                   lambda b, r: (b, 0, 0, 0))] +
                     [pl.BlockSpec((1,) + w.shape[1:], _repeat_index_map(w.ndim))
                      for w in weight_args],
            out_specs=pl.BlockSpec((bblk, H, W, Cin),
                                   lambda b, r: (b, 0, 0, 0)),
            scratch_shapes=[
                pltpu.VMEM((bblk, ph + H, W + 2 * pw, Cin), jnp.float32),
                pltpu.VMEM((bblk, ph + H, W + 2 * pw, Chid), jnp.float32),
            ],
        ),
        compiler_params=pltpu.CompilerParams(
            dimension_semantics=("parallel", "arbitrary"),
            vmem_limit_bytes=48 * 1024 * 1024),
    )(x_bhwc, *weight_args)


# -------- fused head: q_proj + k_proj + causal attention + out_proj ---------

_HEAD_KEYS = ("wq1", "bq1", "wq2", "bq2",
              "wk1", "bk1", "wk2", "bk2",
              "wqm", "bqm", "wkm", "bkm", "wvm", "bvm",
              "woa", "boa", "wo1", "bo1", "wo2", "bo2")


def _make_head_kernel(L, Cin, Dq, Dk, nh, hd):
    scale = 1.0 / math.sqrt(hd)

    def kernel(x_ref, x0_ref, bg_ref,
               wq1, bq1, wq2, bq2, wk1, bk1, wk2, bk2,
               wqm, bqm, wkm, bkm, wvm, bvm,
               woa, boa, wo1, bo1, wo2, bo2, o_ref):
        x = x_ref[0]                                       # (L, Cin)  backbone out
        x0 = x0_ref[0]                                     # (L, Cin)  block input
        bg = bg_ref[0]                                     # (L, 2)    background
        # Build q_in / k_in in VMEM (never materialized in HBM).
        qin = jnp.concatenate([x, bg], axis=-1)            # (L, Dq)
        kin = jnp.concatenate([x, x0, bg], axis=-1)        # (L, Dk)

        def resblock_1x1(inp, w1_r, b1_r, w2_r, b2_r):
            a = _elu(inp).astype(jnp.bfloat16)
            h = jnp.dot(a, w1_r[...],
                        preferred_element_type=jnp.float32) + b1_r[...]
            hb = _elu(h).astype(jnp.bfloat16)              # dropout: identity
            val = jnp.dot(hb, w2_r[0],
                          preferred_element_type=jnp.float32) + b2_r[0]
            gate = jnp.dot(hb, w2_r[1],
                           preferred_element_type=jnp.float32) + b2_r[1]
            return inp + val * _sigmoid(gate)

        query = resblock_1x1(qin, wq1, bq1, wq2, bq2)      # (L, Dq)
        key = resblock_1x1(kin, wk1, bk1, wk2, bk2)        # (L, Dk)

        # Full-width MHA projections (single matmuls, bf16 in / f32 acc).
        qb = query.astype(jnp.bfloat16)
        kb = key.astype(jnp.bfloat16)
        qE = jnp.dot(qb, wqm[...], preferred_element_type=jnp.float32) + bqm[...]
        kE = jnp.dot(kb, wkm[...], preferred_element_type=jnp.float32) + bkm[...]
        vE = jnp.dot(kb, wvm[...], preferred_element_type=jnp.float32) + bvm[...]

        # Causal mask folded into the score (no (L,L) mask tensor).
        row = lax.broadcasted_iota(jnp.int32, (L, L), 0)
        col = lax.broadcasted_iota(jnp.int32, (L, L), 1)
        keep = col <= row

        # Per-head attention; only one (L,L) score/prob matrix live at a time.
        # The aux 1x1 conv of out_proj is accumulated per head, so the per-head
        # context never needs to be concatenated / re-laid-out.
        aux = jnp.zeros((L, Cin), jnp.float32)
        for hidx in range(nh):
            lo = hidx * hd
            qh = qE[:, lo:lo + hd].astype(jnp.bfloat16)
            kh = kE[:, lo:lo + hd].astype(jnp.bfloat16)
            vh = vE[:, lo:lo + hd].astype(jnp.bfloat16)
            s = jnp.einsum('qd,kd->qk', qh, kh,
                           preferred_element_type=jnp.float32) * scale
            s = jnp.where(keep, s, -1e30)
            s = s - jnp.max(s, axis=-1, keepdims=True)
            p = jnp.exp(s)
            p = p * pl.reciprocal(jnp.sum(p, axis=-1, keepdims=True),
                                  approx=True)
            # attention dropout: identity (eval mode)
            ctx = jnp.dot(p.astype(jnp.bfloat16), vh,
                          preferred_element_type=jnp.float32)       # (L, hd)
            aux = aux + jnp.dot(_elu(ctx).astype(jnp.bfloat16), woa[hidx],
                                preferred_element_type=jnp.float32)
        aux = aux + boa[...]

        # out_proj residual block with auxiliary (attention) input.
        h0 = jnp.dot(_elu(x).astype(jnp.bfloat16), wo1[...],
                     preferred_element_type=jnp.float32) + bo1[...] + aux
        h0 = _elu(h0).astype(jnp.bfloat16)                 # dropout: identity
        val = jnp.dot(h0, wo2[0], preferred_element_type=jnp.float32) + bo2[0]
        gate = jnp.dot(h0, wo2[1], preferred_element_type=jnp.float32) + bo2[1]
        o_ref[0] = x + val * _sigmoid(gate)

    return kernel


def pixel_head(x_l, x0_l, bg_l, hp, num_heads):
    B, L, Cin = x_l.shape
    E = Cin // 2
    hd = E // num_heads
    Dq = Cin + 2
    Dk = 2 * Cin + 2
    kernel = _make_head_kernel(L, Cin, Dq, Dk, num_heads, hd)
    weights = [hp[k] for k in _HEAD_KEYS]
    return pl.pallas_call(
        kernel,
        out_shape=jax.ShapeDtypeStruct((B, L, Cin), jnp.float32),
        grid_spec=pltpu.PrefetchScalarGridSpec(
            num_scalar_prefetch=0,
            grid=(B,),
            in_specs=[pl.BlockSpec((1, L, Cin), lambda b: (b, 0, 0)),
                      pl.BlockSpec((1, L, Cin), lambda b: (b, 0, 0)),
                      pl.BlockSpec((1, L, 2), lambda b: (b, 0, 0))] +
                     [pl.BlockSpec(w.shape, _const_index_map(w.ndim))
                      for w in weights],
            out_specs=pl.BlockSpec((1, L, Cin), lambda b: (b, 0, 0)),
        ),
        compiler_params=pltpu.CompilerParams(
            dimension_semantics=("parallel",),
            vmem_limit_bytes=48 * 1024 * 1024),
    )(x_l, x0_l, bg_l, *weights)


# ------------------------------ parameters ----------------------------------

def init_params(rng, in_channels, hidden_channels, kernel_size,
                num_heads, num_repeats):
    kh = kw = kernel_size
    KH, KW = 2 * kh - 1, kw
    E = in_channels // 2
    qdim = in_channels + 2
    kdim = 2 * in_channels + 2

    keys = iter(jax.random.split(rng, 64))

    def nrm(shape, scale=0.1):
        return scale * jax.random.normal(next(keys), shape, dtype=jnp.float32)

    params = {}
    params["backbone"] = [
        dict(
            w1=nrm((KH, KW, in_channels, hidden_channels)),
            b1=nrm((1, hidden_channels)),
            w2=nrm((KH, KW, hidden_channels, 2 * in_channels)),
            b2=nrm((1, 2 * in_channels)),
        )
        for _ in range(num_repeats)
    ]
    params["q_proj"] = dict(
        w1=nrm((qdim, in_channels)), b1=nrm((1, in_channels)),
        w2=nrm((in_channels, 2 * qdim)), b2=nrm((1, 2 * qdim)))
    params["k_proj"] = dict(
        w1=nrm((kdim, in_channels)), b1=nrm((1, in_channels)),
        w2=nrm((in_channels, 2 * kdim)), b2=nrm((1, 2 * kdim)))
    params["mha"] = dict(
        wq=nrm((qdim, E)), bq=nrm((1, E)),
        wk=nrm((kdim, E)), bk=nrm((1, E)),
        wv=nrm((kdim, E)), bv=nrm((1, E)))
    params["out_proj"] = dict(
        w1=nrm((in_channels, in_channels)), b1=nrm((1, in_channels)),
        wa=nrm((E, in_channels)), ba=nrm((1, in_channels)),
        w2=nrm((in_channels, 2 * in_channels)), b2=nrm((1, 2 * in_channels)))
    return params


def _pack_backbone(params, Cin, taps):
    # Weights stacked on a leading repeat axis, per-tap matrices kept separate,
    # GLU value/gate pre-split, matmul weights in bf16 (f32 accumulation).
    bb = params["backbone"]
    w1_all = jnp.stack(
        [jnp.stack([b["w1"][i, j] for (i, j) in taps], 0) for b in bb],
        0).astype(jnp.bfloat16)                                # (R,T,Cin,Chid)
    b1_all = jnp.stack([b["b1"] for b in bb], 0)               # (R,1,Chid) f32
    w2v_all = jnp.stack(
        [jnp.stack([b["w2"][i, j][:, :Cin] for (i, j) in taps], 0) for b in bb],
        0).astype(jnp.bfloat16)                                # (R,T,Chid,Cin)
    w2g_all = jnp.stack(
        [jnp.stack([b["w2"][i, j][:, Cin:] for (i, j) in taps], 0) for b in bb],
        0).astype(jnp.bfloat16)
    b2v_all = jnp.stack([b["b2"][:, :Cin] for b in bb], 0)     # (R,1,Cin) f32
    b2g_all = jnp.stack([b["b2"][:, Cin:] for b in bb], 0)
    return w1_all, b1_all, w2v_all, b2v_all, w2g_all, b2g_all


def _pack_head(params, Cin, num_heads):
    E = Cin // 2
    hd = E // num_heads
    Dq = Cin + 2
    Dk = 2 * Cin + 2
    pq, pk, pm, po = (params["q_proj"], params["k_proj"],
                      params["mha"], params["out_proj"])

    def bf(a):
        return a.astype(jnp.bfloat16)

    def split2(w, b, d):
        return (bf(jnp.stack([w[:, :d], w[:, d:]], 0)),
                jnp.stack([b[:, :d], b[:, d:]], 0))

    wq2, bq2 = split2(pq["w2"], pq["b2"], Dq)
    wk2, bk2 = split2(pk["w2"], pk["b2"], Dk)
    wo2, bo2 = split2(po["w2"], po["b2"], Cin)

    return dict(
        wq1=bf(pq["w1"]), bq1=pq["b1"], wq2=wq2, bq2=bq2,
        wk1=bf(pk["w1"]), bk1=pk["b1"], wk2=wk2, bk2=bk2,
        wqm=bf(pm["wq"]), bqm=pm["bq"],
        wkm=bf(pm["wk"]), bkm=pm["bk"],
        wvm=bf(pm["wv"]), bvm=pm["bv"],
        woa=bf(po["wa"].reshape(num_heads, hd, Cin)), boa=po["ba"],
        wo1=bf(po["w1"]), bo1=po["b1"], wo2=wo2, bo2=bo2)


# ----------------------------- PixelBlock forward ---------------------------

def pixel_block_forward(params, x_nchw, background, kernel_size, num_heads):
    B, Cin, H, W = x_nchw.shape
    kh = kw = kernel_size
    KH, KW = 2 * kh - 1, kw
    ph, pw = (KH - 1) // 2, (KW - 1) // 2
    taps = _causal_taps(KH, KW, capture_center=False)
    L = H * W

    x0 = jnp.transpose(x_nchw, (0, 2, 3, 1)).astype(jnp.float32)   # (B,H,W,C)
    if background.ndim == 3:
        bg = jnp.broadcast_to(background[None], (B,) + background.shape)
    else:
        bg = background
    bg = jnp.transpose(bg, (0, 2, 3, 1)).astype(jnp.float32)       # (B,H,W,2)

    # ---- fused causal backbone (repeats streamed over a grid axis) ----
    bblk = _choose_bblk(B, L)
    bb_w = _pack_backbone(params, Cin, taps)
    x = causal_backbone(x0, *bb_w, taps=taps, ph=ph, pw=pw, bblk=bblk)

    # ---- fused head (q_proj/k_proj/attention/out_proj, one pallas_call) ----
    # q_in / k_in are assembled inside the kernel; only x, x0 and bg are read.
    hp = _pack_head(params, Cin, num_heads)
    out = pixel_head(x.reshape(B, L, Cin), x0.reshape(B, L, Cin),
                     bg.reshape(B, L, 2), hp, num_heads)

    return jnp.transpose(out.reshape(B, H, W, Cin), (0, 3, 1, 2))  # NCHW


# --------------------------------- main --------------------------------------

if __name__ == "__main__":
    B, Cin, H, W = 2, 8, 8, 8
    hidden_channels = 16
    kernel_size = 3
    num_heads = 2
    num_repeats = 2

    root = jax.random.PRNGKey(0)
    kp, kx, kb = jax.random.split(root, 3)
    params = init_params(kp, Cin, hidden_channels, kernel_size,
                         num_heads, num_repeats)

    x = jax.random.normal(kx, (B, Cin, H, W), dtype=jnp.float32)
    background = jax.random.normal(kb, (2, H, W), dtype=jnp.float32)

    out = pixel_block_forward(params, x, background, kernel_size, num_heads)
    out = jax.block_until_ready(out)
    assert out.shape == (B, Cin, H, W)
    assert bool(jnp.all(jnp.isfinite(out)))
    print("KERNEL_OK")
</pallas_src>

<mosaic_0001>
module attributes {stable_mosaic.version = 11 : i64} {
  func.func @kernel(%arg0: i32, %arg1: i32, %arg2: memref<1x8x8x8xf32, #tpu.memory_space<vmem>>, %arg3: memref<1x7x8x16xbf16, #tpu.memory_space<vmem>>, %arg4: memref<1x1x16xf32, #tpu.memory_space<vmem>>, %arg5: memref<1x7x16x8xbf16, #tpu.memory_space<vmem>>, %arg6: memref<1x1x8xf32, #tpu.memory_space<vmem>>, %arg7: memref<1x7x16x8xbf16, #tpu.memory_space<vmem>>, %arg8: memref<1x1x8xf32, #tpu.memory_space<vmem>>, %arg9: memref<1x8x8x8xf32, #tpu.memory_space<vmem>>, %arg10: memref<1x10x10x8xf32, #tpu.memory_space<vmem>>, %arg11: memref<1x10x10x16xf32, #tpu.memory_space<vmem>>) attributes {dimension_semantics = [#tpu.dimension_semantics<parallel>, #tpu.dimension_semantics<arbitrary>], iteration_bounds = array<i64: 2, 2>, scalar_prefetch = 0 : i64, scratch_operands = 2 : i64, tpu.core_type = #tpu.core_type<tc>, window_params = [{transform_indices = @transform_0, window_bounds = array<i64: 1, 8, 8, 8>}, {transform_indices = @transform_1, window_bounds = array<i64: 1, 7, 8, 16>}, {transform_indices = @transform_2, window_bounds = array<i64: 1, 1, 16>}, {transform_indices = @transform_3, window_bounds = array<i64: 1, 7, 16, 8>}, {transform_indices = @transform_4, window_bounds = array<i64: 1, 1, 8>}, {transform_indices = @transform_5, window_bounds = array<i64: 1, 7, 16, 8>}, {transform_indices = @transform_6, window_bounds = array<i64: 1, 1, 8>}, {transform_indices = @transform_7, window_bounds = array<i64: 1, 8, 8, 8>}]} {
    %c0_i32 = arith.constant 0 : i32
    %0 = arith.cmpi eq, %arg1, %c0_i32 : i32
    %1 = arith.extui %0 : i1 to i32
    %c0_i32_0 = arith.constant 0 : i32
    %2 = arith.cmpi ne, %1, %c0_i32_0 : i32
    scf.if %2 {
      %cst_190 = arith.constant 0.000000e+00 : f32
      %176 = vector.broadcast %cst_190 : f32 to vector<1x2x10x8xf32>
      %c0_191 = arith.constant 0 : index
      %c0_192 = arith.constant 0 : index
      %c0_193 = arith.constant 0 : index
      %c0_194 = arith.constant 0 : index
      %177 = vector.load %arg10[%c0_191, %c0_192, %c0_193, %c0_194] : memref<1x10x10x8xf32, #tpu.memory_space<vmem>>, vector<1x2x10x8xf32>
      tpu.vector_store %arg10[%c0_191, %c0_192, %c0_193, %c0_194], %176 {strides = array<i32>} : memref<1x10x10x8xf32, #tpu.memory_space<vmem>>, vector<1x2x10x8xf32>,
      %cst_195 = arith.constant 0.000000e+00 : f32
      %178 = vector.broadcast %cst_195 : f32 to vector<1x2x10x16xf32>
      %c0_196 = arith.constant 0 : index
      %c0_197 = arith.constant 0 : index
      %c0_198 = arith.constant 0 : index
      %c0_199 = arith.constant 0 : index
      %179 = vector.load %arg11[%c0_196, %c0_197, %c0_198, %c0_199] : memref<1x10x10x16xf32, #tpu.memory_space<vmem>>, vector<1x2x10x16xf32>
      tpu.vector_store %arg11[%c0_196, %c0_197, %c0_198, %c0_199], %178 {strides = array<i32>} : memref<1x10x10x16xf32, #tpu.memory_space<vmem>>, vector<1x2x10x16xf32>,
      %cst_200 = arith.constant 0.000000e+00 : f32
      %180 = vector.broadcast %cst_200 : f32 to vector<1x8x1x8xf32>
      %c0_201 = arith.constant 0 : index
      %c2_202 = arith.constant 2 : index
      %c0_203 = arith.constant 0 : index
      %c0_204 = arith.constant 0 : index
      %181 = vector.load %arg10[%c0_201, %c2_202, %c0_203, %c0_204] : memref<1x10x10x8xf32, #tpu.memory_space<vmem>>, vector<1x8x1x8xf32>
      tpu.vector_store %arg10[%c0_201, %c2_202, %c0_203, %c0_204], %180 {strides = array<i32>} : memref<1x10x10x8xf32, #tpu.memory_space<vmem>>, vector<1x8x1x8xf32>,
      %cst_205 = arith.constant 0.000000e+00 : f32
      %182 = vector.broadcast %cst_205 : f32 to vector<1x8x1x8xf32>
      %c0_206 = arith.constant 0 : index
      %c2_207 = arith.constant 2 : index
      %c9 = arith.constant 9 : index
      %c0_208 = arith.constant 0 : index
      %183 = vector.load %arg10[%c0_206, %c2_207, %c9, %c0_208] : memref<1x10x10x8xf32, #tpu.memory_space<vmem>>, vector<1x8x1x8xf32>
      tpu.vector_store %arg10[%c0_206, %c2_207, %c9, %c0_208], %182 {strides = array<i32>} : memref<1x10x10x8xf32, #tpu.memory_space<vmem>>, vector<1x8x1x8xf32>,
      %cst_209 = arith.constant 0.000000e+00 : f32
      %184 = vector.broadcast %cst_209 : f32 to vector<1x8x1x16xf32>
      %c0_210 = arith.constant 0 : index
      %c2_211 = arith.constant 2 : index
      %c0_212 = arith.constant 0 : index
      %c0_213 = arith.constant 0 : index
      %185 = vector.load %arg11[%c0_210, %c2_211, %c0_212, %c0_213] : memref<1x10x10x16xf32, #tpu.memory_space<vmem>>, vector<1x8x1x16xf32>
      tpu.vector_store %arg11[%c0_210, %c2_211, %c0_212, %c0_213], %184 {strides = array<i32>} : memref<1x10x10x16xf32, #tpu.memory_space<vmem>>, vector<1x8x1x16xf32>,
      %cst_214 = arith.constant 0.000000e+00 : f32
      %186 = vector.broadcast %cst_214 : f32 to vector<1x8x1x16xf32>
      %c0_215 = arith.constant 0 : index
      %c2_216 = arith.constant 2 : index
      %c9_217 = arith.constant 9 : index
      %c0_218 = arith.constant 0 : index
      %187 = vector.load %arg11[%c0_215, %c2_216, %c9_217, %c0_218] : memref<1x10x10x16xf32, #tpu.memory_space<vmem>>, vector<1x8x1x16xf32>
      tpu.vector_store %arg11[%c0_215, %c2_216, %c9_217, %c0_218], %186 {strides = array<i32>} : memref<1x10x10x16xf32, #tpu.memory_space<vmem>>, vector<1x8x1x16xf32>,
      %c0_219 = arith.constant 0 : index
      %c0_220 = arith.constant 0 : index
      %c0_221 = arith.constant 0 : index
      %c0_222 = arith.constant 0 : index
      %188 = vector.load %arg2[%c0_219, %c0_220, %c0_221, %c0_222] : memref<1x8x8x8xf32, #tpu.memory_space<vmem>>, vector<1x8x8x8xf32>
      %c0_223 = arith.constant 0 : index
      %c0_224 = arith.constant 0 : index
      %c0_225 = arith.constant 0 : index
      %c0_226 = arith.constant 0 : index
      %189 = vector.load %arg9[%c0_223, %c0_224, %c0_225, %c0_226] : memref<1x8x8x8xf32, #tpu.memory_space<vmem>>, vector<1x8x8x8xf32>
      tpu.vector_store %arg9[%c0_223, %c0_224, %c0_225, %c0_226], %188 {strides = array<i32>} : memref<1x8x8x8xf32, #tpu.memory_space<vmem>>, vector<1x8x8x8xf32>,
    } else {
    }
    %c0 = arith.constant 0 : index
    %c0_1 = arith.constant 0 : index
    %c0_2 = arith.constant 0 : index
    %c0_3 = arith.constant 0 : index
    %3 = vector.load %arg9[%c0, %c0_1, %c0_2, %c0_3] : memref<1x8x8x8xf32, #tpu.memory_space<vmem>>, vector<1x8x8x8xf32>
    %cst = arith.constant 0.000000e+00 : f32
    %4 = vector.broadcast %cst : f32 to vector<1x8x8x8xf32>
    %5 = arith.cmpf ogt, %3, %4 : vector<1x8x8x8xf32>
    %cst_4 = arith.constant 0.000000e+00 : f32
    %6 = vector.broadcast %cst_4 : f32 to vector<1x8x8x8xf32>
    %7 = arith.minimumf %3, %6 : vector<1x8x8x8xf32>
    %8 = math.exp %7 : vector<1x8x8x8xf32>
    %cst_5 = arith.constant 1.000000e+00 : f32
    %9 = vector.broadcast %cst_5 : f32 to vector<1x8x8x8xf32>
    %10 = arith.subf %8, %9 : vector<1x8x8x8xf32>
    %11 = arith.select %5, %3, %10 : vector<1x8x8x8xi1>, vector<1x8x8x8xf32>
    %c0_6 = arith.constant 0 : index
    %c2 = arith.constant 2 : index
    %c1 = arith.constant 1 : index
    %c0_7 = arith.constant 0 : index
    %12 = vector.load %arg10[%c0_6, %c2, %c1, %c0_7] : memref<1x10x10x8xf32, #tpu.memory_space<vmem>>, vector<1x8x8x8xf32>
    tpu.vector_store %arg10[%c0_6, %c2, %c1, %c0_7], %11 {strides = array<i32>} : memref<1x10x10x8xf32, #tpu.memory_space<vmem>>, vector<1x8x8x8xf32>,
    %c0_8 = arith.constant 0 : index
    %c0_9 = arith.constant 0 : index
    %c0_10 = arith.constant 0 : index
    %c0_11 = arith.constant 0 : index
    %13 = vector.load %arg10[%c0_8, %c0_9, %c0_10, %c0_11] : memref<1x10x10x8xf32, #tpu.memory_space<vmem>>, vector<1x8x8x8xf32>
    %14 = vector.shape_cast %13 : vector<1x8x8x8xf32> to vector<64x8xf32>
    %15 = arith.truncf %14 : vector<64x8xf32> to vector<64x8xbf16>
    %c0_12 = arith.constant 0 : index
    %c0_13 = arith.constant 0 : index
    %c0_14 = arith.constant 0 : index
    %c0_15 = arith.constant 0 : index
    %16 = vector.load %arg3[%c0_12, %c0_13, %c0_14, %c0_15] : memref<1x7x8x16xbf16, #tpu.memory_space<vmem>>, vector<1x1x8x16xbf16>
    %17 = vector.shape_cast %16 : vector<1x1x8x16xbf16> to vector<8x16xbf16>
    %cst_16 = arith.constant dense<0.000000e+00> : vector<64x16xf32>
    %18 = tpu.matmul %15, %17, %cst_16 {dimension_numbers = #tpu.dot_dimension_numbers<[1], [0], [0], [1], [0, 0, 1, 1], [], []>} : vector<64x8xbf16>, vector<8x16xbf16>, vector<64x16xf32> -> vector<64x16xf32>
    %c0_17 = arith.constant 0 : index
    %c0_18 = arith.constant 0 : index
    %c1_19 = arith.constant 1 : index
    %c0_20 = arith.constant 0 : index
    %19 = vector.load %arg10[%c0_17, %c0_18, %c1_19, %c0_20] : memref<1x10x10x8xf32, #tpu.memory_space<vmem>>, vector<1x8x8x8xf32>
    %20 = vector.shape_cast %19 : vector<1x8x8x8xf32> to vector<64x8xf32>
    %21 = arith.truncf %20 : vector<64x8xf32> to vector<64x8xbf16>
    %c0_21 = arith.constant 0 : index
    %c1_22 = arith.constant 1 : index
    %c0_23 = arith.constant 0 : index
    %c0_24 = arith.constant 0 : index
    %22 = vector.load %arg3[%c0_21, %c1_22, %c0_23, %c0_24] : memref<1x7x8x16xbf16, #tpu.memory_space<vmem>>, vector<1x1x8x16xbf16>
    %23 = vector.shape_cast %22 : vector<1x1x8x16xbf16> to vector<8x16xbf16>
    %cst_25 = arith.constant dense<0.000000e+00> : vector<64x16xf32>
    %24 = tpu.matmul %21, %23, %cst_25 {dimension_numbers = #tpu.dot_dimension_numbers<[1], [0], [0], [1], [0, 0, 1, 1], [], []>} : vector<64x8xbf16>, vector<8x16xbf16>, vector<64x16xf32> -> vector<64x16xf32>
    %25 = arith.addf %18, %24 : vector<64x16xf32>
    %c0_26 = arith.constant 0 : index
    %c0_27 = arith.constant 0 : index
    %c2_28 = arith.constant 2 : index
    %c0_29 = arith.constant 0 : index
    %26 = vector.load %arg10[%c0_26, %c0_27, %c2_28, %c0_29] : memref<1x10x10x8xf32, #tpu.memory_space<vmem>>, vector<1x8x8x8xf32>
    %27 = vector.shape_cast %26 : vector<1x8x8x8xf32> to vector<64x8xf32>
    %28 = arith.truncf %27 : vector<64x8xf32> to vector<64x8xbf16>
    %c0_30 = arith.constant 0 : index
    %c2_31 = arith.constant 2 : index
    %c0_32 = arith.constant 0 : index
    %c0_33 = arith.constant 0 : index
    %29 = vector.load %arg3[%c0_30, %c2_31, %c0_32, %c0_33] : memref<1x7x8x16xbf16, #tpu.memory_space<vmem>>, vector<1x1x8x16xbf16>
    %30 = vector.shape_cast %29 : vector<1x1x8x16xbf16> to vector<8x16xbf16>
    %cst_34 = arith.constant dense<0.000000e+00> : vector<64x16xf32>
    %31 = tpu.matmul %28, %30, %cst_34 {dimension_numbers = #tpu.dot_dimension_numbers<[1], [0], [0], [1], [0, 0, 1, 1], [], []>} : vector<64x8xbf16>, vector<8x16xbf16>, vector<64x16xf32> -> vector<64x16xf32>
    %32 = arith.addf %25, %31 : vector<64x16xf32>
    %c0_35 = arith.constant 0 : index
    %c1_36 = arith.constant 1 : index
    %c0_37 = arith.constant 0 : index
    %c0_38 = arith.constant 0 : index
    %33 = vector.load %arg10[%c0_35, %c1_36, %c0_37, %c0_38] : memref<1x10x10x8xf32, #tpu.memory_space<vmem>>, vector<1x8x8x8xf32>
    %34 = vector.shape_cast %33 : vector<1x8x8x8xf32> to vector<64x8xf32>
    %35 = arith.truncf %34 : vector<64x8xf32> to vector<64x8xbf16>
    %c0_39 = arith.constant 0 : index
    %c3 = arith.constant 3 : index
    %c0_40 = arith.constant 0 : index
    %c0_41 = arith.constant 0 : index
    %36 = vector.load %arg3[%c0_39, %c3, %c0_40, %c0_41] : memref<1x7x8x16xbf16, #tpu.memory_space<vmem>>, vector<1x1x8x16xbf16>
    %37 = vector.shape_cast %36 : vector<1x1x8x16xbf16> to vector<8x16xbf16>
    %cst_42 = arith.constant dense<0.000000e+00> : vector<64x16xf32>
    %38 = tpu.matmul %35, %37, %cst_42 {dimension_numbers = #tpu.dot_dimension_numbers<[1], [0], [0], [1], [0, 0, 1, 1], [], []>} : vector<64x8xbf16>, vector<8x16xbf16>, vector<64x16xf32> -> vector<64x16xf32>
    %39 = arith.addf %32, %38 : vector<64x16xf32>
    %c0_43 = arith.constant 0 : index
    %c1_44 = arith.constant 1 : index
    %c1_45 = arith.constant 1 : index
    %c0_46 = arith.constant 0 : index
    %40 = vector.load %arg10[%c0_43, %c1_44, %c1_45, %c0_46] : memref<1x10x10x8xf32, #tpu.memory_space<vmem>>, vector<1x8x8x8xf32>
    %41 = vector.shape_cast %40 : vector<1x8x8x8xf32> to vector<64x8xf32>
    %42 = arith.truncf %41 : vector<64x8xf32> to vector<64x8xbf16>
    %c0_47 = arith.constant 0 : index
    %c4 = arith.constant 4 : index
    %c0_48 = arith.constant 0 : index
    %c0_49 = arith.constant 0 : index
    %43 = vector.load %arg3[%c0_47, %c4, %c0_48, %c0_49] : memref<1x7x8x16xbf16, #tpu.memory_space<vmem>>, vector<1x1x8x16xbf16>
    %44 = vector.shape_cast %43 : vector<1x1x8x16xbf16> to vector<8x16xbf16>
    %cst_50 = arith.constant dense<0.000000e+00> : vector<64x16xf32>
    %45 = tpu.matmul %42, %44, %cst_50 {dimension_numbers = #tpu.dot_dimension_numbers<[1], [0], [0], [1], [0, 0, 1, 1], [], []>} : vector<64x8xbf16>, vector<8x16xbf16>, vector<64x16xf32> -> vector<64x16xf32>
    %46 = arith.addf %39, %45 : vector<64x16xf32>
    %c0_51 = arith.constant 0 : index
    %c1_52 = arith.constant 1 : index
    %c2_53 = arith.constant 2 : index
    %c0_54 = arith.constant 0 : index
    %47 = vector.load %arg10[%c0_51, %c1_52, %c2_53, %c0_54] : memref<1x10x10x8xf32, #tpu.memory_space<vmem>>, vector<1x8x8x8xf32>
    %48 = vector.shape_cast %47 : vector<1x8x8x8xf32> to vector<64x8xf32>
    %49 = arith.truncf %48 : vector<64x8xf32> to vector<64x8xbf16>
    %c0_55 = arith.constant 0 : index
    %c5 = arith.constant 5 : index
    %c0_56 = arith.constant 0 : index
    %c0_57 = arith.constant 0 : index
    %50 = vector.load %arg3[%c0_55, %c5, %c0_56, %c0_57] : memref<1x7x8x16xbf16, #tpu.memory_space<vmem>>, vector<1x1x8x16xbf16>
    %51 = vector.shape_cast %50 : vector<1x1x8x16xbf16> to vector<8x16xbf16>
    %cst_58 = arith.constant dense<0.000000e+00> : vector<64x16xf32>
    %52 = tpu.matmul %49, %51, %cst_58 {dimension_numbers = #tpu.dot_dimension_numbers<[1], [0], [0], [1], [0, 0, 1, 1], [], []>} : vector<64x8xbf16>, vector<8x16xbf16>, vector<64x16xf32> -> vector<64x16xf32>
    %53 = arith.addf %46, %52 : vector<64x16xf32>
    %c0_59 = arith.constant 0 : index
    %c2_60 = arith.constant 2 : index
    %c0_61 = arith.constant 0 : index
    %c0_62 = arith.constant 0 : index
    %54 = vector.load %arg10[%c0_59, %c2_60, %c0_61, %c0_62] : memref<1x10x10x8xf32, #tpu.memory_space<vmem>>, vector<1x8x8x8xf32>
    %55 = vector.shape_cast %54 : vector<1x8x8x8xf32> to vector<64x8xf32>
    %56 = arith.truncf %55 : vector<64x8xf32> to vector<64x8xbf16>
    %c0_63 = arith.constant 0 : index
    %c6 = arith.constant 6 : index
    %c0_64 = arith.constant 0 : index
    %c0_65 = arith.constant 0 : index
    %57 = vector.load %arg3[%c0_63, %c6, %c0_64, %c0_65] : memref<1x7x8x16xbf16, #tpu.memory_space<vmem>>, vector<1x1x8x16xbf16>
    %58 = vector.shape_cast %57 : vector<1x1x8x16xbf16> to vector<8x16xbf16>
    %cst_66 = arith.constant dense<0.000000e+00> : vector<64x16xf32>
    %59 = tpu.matmul %56, %58, %cst_66 {dimension_numbers = #tpu.dot_dimension_numbers<[1], [0], [0], [1], [0, 0, 1, 1], [], []>} : vector<64x8xbf16>, vector<8x16xbf16>, vector<64x16xf32> -> vector<64x16xf32>
    %60 = arith.addf %53, %59 : vector<64x16xf32>
    %c0_67 = arith.constant 0 : index
    %c0_68 = arith.constant 0 : index
    %c0_69 = arith.constant 0 : index
    %61 = vector.load %arg4[%c0_67, %c0_68, %c0_69] : memref<1x1x16xf32, #tpu.memory_space<vmem>>, vector<1x1x16xf32>
    %62 = vector.shape_cast %61 : vector<1x1x16xf32> to vector<1x16xf32>
    %63 = vector.broadcast %62 : vector<1x16xf32> to vector<64x16xf32>
    %64 = arith.addf %60, %63 : vector<64x16xf32>
    %cst_70 = arith.constant 0.000000e+00 : f32
    %65 = vector.broadcast %cst_70 : f32 to vector<64x16xf32>
    %66 = arith.cmpf ogt, %64, %65 : vector<64x16xf32>
    %cst_71 = arith.constant 0.000000e+00 : f32
    %67 = vector.broadcast %cst_71 : f32 to vector<64x16xf32>
    %68 = arith.minimumf %64, %67 : vector<64x16xf32>
    %69 = math.exp %68 : vector<64x16xf32>
    %cst_72 = arith.constant 1.000000e+00 : f32
    %70 = vector.broadcast %cst_72 : f32 to vector<64x16xf32>
    %71 = arith.subf %69, %70 : vector<64x16xf32>
    %72 = arith.select %66, %64, %71 : vector<64x16xi1>, vector<64x16xf32>
    %73 = vector.shape_cast %72 : vector<64x16xf32> to vector<1x8x8x16xf32>
    %c0_73 = arith.constant 0 : index
    %c2_74 = arith.constant 2 : index
    %c1_75 = arith.constant 1 : index
    %c0_76 = arith.constant 0 : index
    %74 = vector.load %arg11[%c0_73, %c2_74, %c1_75, %c0_76] : memref<1x10x10x16xf32, #tpu.memory_space<vmem>>, vector<1x8x8x16xf32>
    tpu.vector_store %arg11[%c0_73, %c2_74, %c1_75, %c0_76], %73 {strides = array<i32>} : memref<1x10x10x16xf32, #tpu.memory_space<vmem>>, vector<1x8x8x16xf32>,
    %c0_77 = arith.constant 0 : index
    %c0_78 = arith.constant 0 : index
    %c0_79 = arith.constant 0 : index
    %c0_80 = arith.constant 0 : index
    %75 = vector.load %arg11[%c0_77, %c0_78, %c0_79, %c0_80] : memref<1x10x10x16xf32, #tpu.memory_space<vmem>>, vector<1x8x8x16xf32>
    %76 = vector.shape_cast %75 : vector<1x8x8x16xf32> to vector<64x16xf32>
    %77 = arith.truncf %76 : vector<64x16xf32> to vector<64x16xbf16>
    %c0_81 = arith.constant 0 : index
    %c0_82 = arith.constant 0 : index
    %c0_83 = arith.constant 0 : index
    %c0_84 = arith.constant 0 : index
    %78 = vector.load %arg5[%c0_81, %c0_82, %c0_83, %c0_84] : memref<1x7x16x8xbf16, #tpu.memory_space<vmem>>, vector<1x1x16x8xbf16>
    %79 = vector.shape_cast %78 : vector<1x1x16x8xbf16> to vector<16x8xbf16>
    %cst_85 = arith.constant dense<0.000000e+00> : vector<64x8xf32>
    %80 = tpu.matmul %77, %79, %cst_85 {dimension_numbers = #tpu.dot_dimension_numbers<[1], [0], [0], [1], [0, 0, 1, 1], [], []>} : vector<64x16xbf16>, vector<16x8xbf16>, vector<64x8xf32> -> vector<64x8xf32>
    %c0_86 = arith.constant 0 : index
    %c0_87 = arith.constant 0 : index
    %c0_88 = arith.constant 0 : index
    %c0_89 = arith.constant 0 : index
    %81 = vector.load %arg7[%c0_86, %c0_87, %c0_88, %c0_89] : memref<1x7x16x8xbf16, #tpu.memory_space<vmem>>, vector<1x1x16x8xbf16>
    %82 = vector.shape_cast %81 : vector<1x1x16x8xbf16> to vector<16x8xbf16>
    %cst_90 = arith.constant dense<0.000000e+00> : vector<64x8xf32>
    %83 = tpu.matmul %77, %82, %cst_90 {dimension_numbers = #tpu.dot_dimension_numbers<[1], [0], [0], [1], [0, 0, 1, 1], [], []>} : vector<64x16xbf16>, vector<16x8xbf16>, vector<64x8xf32> -> vector<64x8xf32>
    %c0_91 = arith.constant 0 : index
    %c0_92 = arith.constant 0 : index
    %c1_93 = arith.constant 1 : index
    %c0_94 = arith.constant 0 : index
    %84 = vector.load %arg11[%c0_91, %c0_92, %c1_93, %c0_94] : memref<1x10x10x16xf32, #tpu.memory_space<vmem>>, vector<1x8x8x16xf32>
    %85 = vector.shape_cast %84 : vector<1x8x8x16xf32> to vector<64x16xf32>
    %86 = arith.truncf %85 : vector<64x16xf32> to vector<64x16xbf16>
    %c0_95 = arith.constant 0 : index
    %c1_96 = arith.constant 1 : index
    %c0_97 = arith.constant 0 : index
    %c0_98 = arith.constant 0 : index
    %87 = vector.load %arg5[%c0_95, %c1_96, %c0_97, %c0_98] : memref<1x7x16x8xbf16, #tpu.memory_space<vmem>>, vector<1x1x16x8xbf16>
    %88 = vector.shape_cast %87 : vector<1x1x16x8xbf16> to vector<16x8xbf16>
    %cst_99 = arith.constant dense<0.000000e+00> : vector<64x8xf32>
    %89 = tpu.matmul %86, %88, %cst_99 {dimension_numbers = #tpu.dot_dimension_numbers<[1], [0], [0], [1], [0, 0, 1, 1], [], []>} : vector<64x16xbf16>, vector<16x8xbf16>, vector<64x8xf32> -> vector<64x8xf32>
    %c0_100 = arith.constant 0 : index
    %c1_101 = arith.constant 1 : index
    %c0_102 = arith.constant 0 : index
    %c0_103 = arith.constant 0 : index
    %90 = vector.load %arg7[%c0_100, %c1_101, %c0_102, %c0_103] : memref<1x7x16x8xbf16, #tpu.memory_space<vmem>>, vector<1x1x16x8xbf16>
    %91 = vector.shape_cast %90 : vector<1x1x16x8xbf16> to vector<16x8xbf16>
    %cst_104 = arith.constant dense<0.000000e+00> : vector<64x8xf32>
    %92 = tpu.matmul %86, %91, %cst_104 {dimension_numbers = #tpu.dot_dimension_numbers<[1], [0], [0], [1], [0, 0, 1, 1], [], []>} : vector<64x16xbf16>, vector<16x8xbf16>, vector<64x8xf32> -> vector<64x8xf32>
    %93 = arith.addf %80, %89 : vector<64x8xf32>
    %94 = arith.addf %83, %92 : vector<64x8xf32>
    %c0_105 = arith.constant 0 : index
    %c0_106 = arith.constant 0 : index
    %c2_107 = arith.constant 2 : index
    %c0_108 = arith.constant 0 : index
    %95 = vector.load %arg11[%c0_105, %c0_106, %c2_107, %c0_108] : memref<1x10x10x16xf32, #tpu.memory_space<vmem>>, vector<1x8x8x16xf32>
    %96 = vector.shape_cast %95 : vector<1x8x8x16xf32> to vector<64x16xf32>
    %97 = arith.truncf %96 : vector<64x16xf32> to vector<64x16xbf16>
    %c0_109 = arith.constant 0 : index
    %c2_110 = arith.constant 2 : index
    %c0_111 = arith.constant 0 : index
    %c0_112 = arith.constant 0 : index
    %98 = vector.load %arg5[%c0_109, %c2_110, %c0_111, %c0_112] : memref<1x7x16x8xbf16, #tpu.memory_space<vmem>>, vector<1x1x16x8xbf16>
    %99 = vector.shape_cast %98 : vector<1x1x16x8xbf16> to vector<16x8xbf16>
    %cst_113 = arith.constant dense<0.000000e+00> : vector<64x8xf32>
    %100 = tpu.matmul %97, %99, %cst_113 {dimension_numbers = #tpu.dot_dimension_numbers<[1], [0], [0], [1], [0, 0, 1, 1], [], []>} : vector<64x16xbf16>, vector<16x8xbf16>, vector<64x8xf32> -> vector<64x8xf32>
    %c0_114 = arith.constant 0 : index
    %c2_115 = arith.constant 2 : index
    %c0_116 = arith.constant 0 : index
    %c0_117 = arith.constant 0 : index
    %101 = vector.load %arg7[%c0_114, %c2_115, %c0_116, %c0_117] : memref<1x7x16x8xbf16, #tpu.memory_space<vmem>>, vector<1x1x16x8xbf16>
    %102 = vector.shape_cast %101 : vector<1x1x16x8xbf16> to vector<16x8xbf16>
    %cst_118 = arith.constant dense<0.000000e+00> : vector<64x8xf32>
    %103 = tpu.matmul %97, %102, %cst_118 {dimension_numbers = #tpu.dot_dimension_numbers<[1], [0], [0], [1], [0, 0, 1, 1], [], []>} : vector<64x16xbf16>, vector<16x8xbf16>, vector<64x8xf32> -> vector<64x8xf32>
    %104 = arith.addf %93, %100 : vector<64x8xf32>
    %105 = arith.addf %94, %103 : vector<64x8xf32>
    %c0_119 = arith.constant 0 : index
    %c1_120 = arith.constant 1 : index
    %c0_121 = arith.constant 0 : index
    %c0_122 = arith.constant 0 : index
    %106 = vector.load %arg11[%c0_119, %c1_120, %c0_121, %c0_122] : memref<1x10x10x16xf32, #tpu.memory_space<vmem>>, vector<1x8x8x16xf32>
    %107 = vector.shape_cast %106 : vector<1x8x8x16xf32> to vector<64x16xf32>
    %108 = arith.truncf %107 : vector<64x16xf32> to vector<64x16xbf16>
    %c0_123 = arith.constant 0 : index
    %c3_124 = arith.constant 3 : index
    %c0_125 = arith.constant 0 : index
    %c0_126 = arith.constant 0 : index
    %109 = vector.load %arg5[%c0_123, %c3_124, %c0_125, %c0_126] : memref<1x7x16x8xbf16, #tpu.memory_space<vmem>>, vector<1x1x16x8xbf16>
    %110 = vector.shape_cast %109 : vector<1x1x16x8xbf16> to vector<16x8xbf16>
    %cst_127 = arith.constant dense<0.000000e+00> : vector<64x8xf32>
    %111 = tpu.matmul %108, %110, %cst_127 {dimension_numbers = #tpu.dot_dimension_numbers<[1], [0], [0], [1], [0, 0, 1, 1], [], []>} : vector<64x16xbf16>, vector<16x8xbf16>, vector<64x8xf32> -> vector<64x8xf32>
    %c0_128 = arith.constant 0 : index
    %c3_129 = arith.constant 3 : index
    %c0_130 = arith.constant 0 : index
    %c0_131 = arith.constant 0 : index
    %112 = vector.load %arg7[%c0_128, %c3_129, %c0_130, %c0_131] : memref<1x7x16x8xbf16, #tpu.memory_space<vmem>>, vector<1x1x16x8xbf16>
    %113 = vector.shape_cast %112 : vector<1x1x16x8xbf16> to vector<16x8xbf16>
    %cst_132 = arith.constant dense<0.000000e+00> : vector<64x8xf32>
    %114 = tpu.matmul %108, %113, %cst_132 {dimension_numbers = #tpu.dot_dimension_numbers<[1], [0], [0], [1], [0, 0, 1, 1], [], []>} : vector<64x16xbf16>, vector<16x8xbf16>, vector<64x8xf32> -> vector<64x8xf32>
    %115 = arith.addf %104, %111 : vector<64x8xf32>
    %116 = arith.addf %105, %114 : vector<64x8xf32>
    %c0_133 = arith.constant 0 : index
    %c1_134 = arith.constant 1 : index
    %c1_135 = arith.constant 1 : index
    %c0_136 = arith.constant 0 : index
    %117 = vector.load %arg11[%c0_133, %c1_134, %c1_135, %c0_136] : memref<1x10x10x16xf32, #tpu.memory_space<vmem>>, vector<1x8x8x16xf32>
    %118 = vector.shape_cast %117 : vector<1x8x8x16xf32> to vector<64x16xf32>
    %119 = arith.truncf %118 : vector<64x16xf32> to vector<64x16xbf16>
    %c0_137 = arith.constant 0 : index
    %c4_138 = arith.constant 4 : index
    %c0_139 = arith.constant 0 : index
    %c0_140 = arith.constant 0 : index
    %120 = vector.load %arg5[%c0_137, %c4_138, %c0_139, %c0_140] : memref<1x7x16x8xbf16, #tpu.memory_space<vmem>>, vector<1x1x16x8xbf16>
    %121 = vector.shape_cast %120 : vector<1x1x16x8xbf16> to vector<16x8xbf16>
    %cst_141 = arith.constant dense<0.000000e+00> : vector<64x8xf32>
    %122 = tpu.matmul %119, %121, %cst_141 {dimension_numbers = #tpu.dot_dimension_numbers<[1], [0], [0], [1], [0, 0, 1, 1], [], []>} : vector<64x16xbf16>, vector<16x8xbf16>, vector<64x8xf32> -> vector<64x8xf32>
    %c0_142 = arith.constant 0 : index
    %c4_143 = arith.constant 4 : index
    %c0_144 = arith.constant 0 : index
    %c0_145 = arith.constant 0 : index
    %123 = vector.load %arg7[%c0_142, %c4_143, %c0_144, %c0_145] : memref<1x7x16x8xbf16, #tpu.memory_space<vmem>>, vector<1x1x16x8xbf16>
    %124 = vector.shape_cast %123 : vector<1x1x16x8xbf16> to vector<16x8xbf16>
    %cst_146 = arith.constant dense<0.000000e+00> : vector<64x8xf32>
    %125 = tpu.matmul %119, %124, %cst_146 {dimension_numbers = #tpu.dot_dimension_numbers<[1], [0], [0], [1], [0, 0, 1, 1], [], []>} : vector<64x16xbf16>, vector<16x8xbf16>, vector<64x8xf32> -> vector<64x8xf32>
    %126 = arith.addf %115, %122 : vector<64x8xf32>
    %127 = arith.addf %116, %125 : vector<64x8xf32>
    %c0_147 = arith.constant 0 : index
    %c1_148 = arith.constant 1 : index
    %c2_149 = arith.constant 2 : index
    %c0_150 = arith.constant 0 : index
    %128 = vector.load %arg11[%c0_147, %c1_148, %c2_149, %c0_150] : memref<1x10x10x16xf32, #tpu.memory_space<vmem>>, vector<1x8x8x16xf32>
    %129 = vector.shape_cast %128 : vector<1x8x8x16xf32> to vector<64x16xf32>
    %130 = arith.truncf %129 : vector<64x16xf32> to vector<64x16xbf16>
    %c0_151 = arith.constant 0 : index
    %c5_152 = arith.constant 5 : index
    %c0_153 = arith.constant 0 : index
    %c0_154 = arith.constant 0 : index
    %131 = vector.load %arg5[%c0_151, %c5_152, %c0_153, %c0_154] : memref<1x7x16x8xbf16, #tpu.memory_space<vmem>>, vector<1x1x16x8xbf16>
    %132 = vector.shape_cast %131 : vector<1x1x16x8xbf16> to vector<16x8xbf16>
    %cst_155 = arith.constant dense<0.000000e+00> : vector<64x8xf32>
    %133 = tpu.matmul %130, %132, %cst_155 {dimension_numbers = #tpu.dot_dimension_numbers<[1], [0], [0], [1], [0, 0, 1, 1], [], []>} : vector<64x16xbf16>, vector<16x8xbf16>, vector<64x8xf32> -> vector<64x8xf32>
    %c0_156 = arith.constant 0 : index
    %c5_157 = arith.constant 5 : index
    %c0_158 = arith.constant 0 : index
    %c0_159 = arith.constant 0 : index
    %134 = vector.load %arg7[%c0_156, %c5_157, %c0_158, %c0_159] : memref<1x7x16x8xbf16, #tpu.memory_space<vmem>>, vector<1x1x16x8xbf16>
    %135 = vector.shape_cast %134 : vector<1x1x16x8xbf16> to vector<16x8xbf16>
    %cst_160 = arith.constant dense<0.000000e+00> : vector<64x8xf32>
    %136 = tpu.matmul %130, %135, %cst_160 {dimension_numbers = #tpu.dot_dimension_numbers<[1], [0], [0], [1], [0, 0, 1, 1], [], []>} : vector<64x16xbf16>, vector<16x8xbf16>, vector<64x8xf32> -> vector<64x8xf32>
    %137 = arith.addf %126, %133 : vector<64x8xf32>
    %138 = arith.addf %127, %136 : vector<64x8xf32>
    %c0_161 = arith.constant 0 : index
    %c2_162 = arith.constant 2 : index
    %c0_163 = arith.constant 0 : index
    %c0_164 = arith.constant 0 : index
    %139 = vector.load %arg11[%c0_161, %c2_162, %c0_163, %c0_164] : memref<1x10x10x16xf32, #tpu.memory_space<vmem>>, vector<1x8x8x16xf32>
    %140 = vector.shape_cast %139 : vector<1x8x8x16xf32> to vector<64x16xf32>
    %141 = arith.truncf %140 : vector<64x16xf32> to vector<64x16xbf16>
    %c0_165 = arith.constant 0 : index
    %c6_166 = arith.constant 6 : index
    %c0_167 = arith.constant 0 : index
    %c0_168 = arith.constant 0 : index
    %142 = vector.load %arg5[%c0_165, %c6_166, %c0_167, %c0_168] : memref<1x7x16x8xbf16, #tpu.memory_space<vmem>>, vector<1x1x16x8xbf16>
    %143 = vector.shape_cast %142 : vector<1x1x16x8xbf16> to vector<16x8xbf16>
    %cst_169 = arith.constant dense<0.000000e+00> : vector<64x8xf32>
    %144 = tpu.matmul %141, %143, %cst_169 {dimension_numbers = #tpu.dot_dimension_numbers<[1], [0], [0], [1], [0, 0, 1, 1], [], []>} : vector<64x16xbf16>, vector<16x8xbf16>, vector<64x8xf32> -> vector<64x8xf32>
    %c0_170 = arith.constant 0 : index
    %c6_171 = arith.constant 6 : index
    %c0_172 = arith.constant 0 : index
    %c0_173 = arith.constant 0 : index
    %145 = vector.load %arg7[%c0_170, %c6_171, %c0_172, %c0_173] : memref<1x7x16x8xbf16, #tpu.memory_space<vmem>>, vector<1x1x16x8xbf16>
    %146 = vector.shape_cast %145 : vector<1x1x16x8xbf16> to vector<16x8xbf16>
    %cst_174 = arith.constant dense<0.000000e+00> : vector<64x8xf32>
    %147 = tpu.matmul %141, %146, %cst_174 {dimension_numbers = #tpu.dot_dimension_numbers<[1], [0], [0], [1], [0, 0, 1, 1], [], []>} : vector<64x16xbf16>, vector<16x8xbf16>, vector<64x8xf32> -> vector<64x8xf32>
    %148 = arith.addf %137, %144 : vector<64x8xf32>
    %149 = arith.addf %138, %147 : vector<64x8xf32>
    %c0_175 = arith.constant 0 : index
    %c0_176 = arith.constant 0 : index
    %c0_177 = arith.constant 0 : index
    %150 = vector.load %arg6[%c0_175, %c0_176, %c0_177] : memref<1x1x8xf32, #tpu.memory_space<vmem>>, vector<1x1x8xf32>
    %151 = vector.shape_cast %150 : vector<1x1x8xf32> to vector<1x8xf32>
    %152 = vector.broadcast %151 : vector<1x8xf32> to vector<64x8xf32>
    %153 = arith.addf %148, %152 : vector<64x8xf32>
    %c0_178 = arith.constant 0 : index
    %c0_179 = arith.constant 0 : index
    %c0_180 = arith.constant 0 : index
    %154 = vector.load %arg8[%c0_178, %c0_179, %c0_180] : memref<1x1x8xf32, #tpu.memory_space<vmem>>, vector<1x1x8xf32>
    %155 = vector.shape_cast %154 : vector<1x1x8xf32> to vector<1x8xf32>
    %156 = vector.broadcast %155 : vector<1x8xf32> to vector<64x8xf32>
    %157 = arith.addf %149, %156 : vector<64x8xf32>
    %158 = math.absf %157 : vector<64x8xf32>
    %cst_181 = arith.constant 0.000000e+00 : f32
    %159 = vector.broadcast %cst_181 : f32 to vector<64x8xf32>
    %160 = arith.subf %159, %158 : vector<64x8xf32>
    %161 = math.exp %160 : vector<64x8xf32>
    %cst_182 = arith.constant 0.000000e+00 : f32
    %162 = vector.broadcast %cst_182 : f32 to vector<64x8xf32>
    %163 = arith.cmpf oge, %157, %162 : vector<64x8xf32>
    %cst_183 = arith.constant 1.000000e+00 : f32
    %164 = vector.broadcast %cst_183 : f32 to vector<64x8xf32>
    %165 = arith.addf %164, %161 : vector<64x8xf32>
    %cst_184 = arith.constant 1.000000e+00 : f32
    %166 = vector.broadcast %cst_184 : f32 to vector<64x8xf32>
    %167 = arith.divf %166, %165 : vector<64x8xf32>
    %cst_185 = arith.constant 1.000000e+00 : f32
    %168 = vector.broadcast %cst_185 : f32 to vector<64x8xf32>
    %169 = arith.addf %168, %161 : vector<64x8xf32>
    %170 = arith.divf %161, %169 : vector<64x8xf32>
    %171 = arith.select %163, %167, %170 : vector<64x8xi1>, vector<64x8xf32>
    %172 = arith.mulf %153, %171 : vector<64x8xf32>
    %173 = vector.shape_cast %172 : vector<64x8xf32> to vector<1x8x8x8xf32>
    %174 = arith.addf %3, %173 : vector<1x8x8x8xf32>
    %c0_186 = arith.constant 0 : index
    %c0_187 = arith.constant 0 : index
    %c0_188 = arith.constant 0 : index
    %c0_189 = arith.constant 0 : index
    %175 = vector.load %arg9[%c0_186, %c0_187, %c0_188, %c0_189] : memref<1x8x8x8xf32, #tpu.memory_space<vmem>>, vector<1x8x8x8xf32>
    tpu.vector_store %arg9[%c0_186, %c0_187, %c0_188, %c0_189], %174 {strides = array<i32>} : memref<1x8x8x8xf32, #tpu.memory_space<vmem>>, vector<1x8x8x8xf32>,
    return
  }
  func.func @transform_0(%arg0: i32, %arg1: i32) -> (i32, i32, i32, i32) {
    %c0_i32 = arith.constant 0 : i32
    %c0_i32_0 = arith.constant 0 : i32
    %c0_i32_1 = arith.constant 0 : i32
    %c0_i32_2 = arith.constant 0 : i32
    return %arg0, %c0_i32, %c0_i32_0, %c0_i32_1 : i32, i32, i32, i32
  }
  func.func @transform_1(%arg0: i32, %arg1: i32) -> (i32, i32, i32, i32) {
    %c0_i32 = arith.constant 0 : i32
    %c0_i32_0 = arith.constant 0 : i32
    %c0_i32_1 = arith.constant 0 : i32
    %c0_i32_2 = arith.constant 0 : i32
    return %arg1, %c0_i32, %c0_i32_0, %c0_i32_1 : i32, i32, i32, i32
  }
  func.func @transform_2(%arg0: i32, %arg1: i32) -> (i32, i32, i32) {
    %c0_i32 = arith.constant 0 : i32
    %c0_i32_0 = arith.constant 0 : i32
    %c0_i32_1 = arith.constant 0 : i32
    return %arg1, %c0_i32, %c0_i32_0 : i32, i32, i32
  }
  func.func @transform_3(%arg0: i32, %arg1: i32) -> (i32, i32, i32, i32) {
    %c0_i32 = arith.constant 0 : i32
    %c0_i32_0 = arith.constant 0 : i32
    %c0_i32_1 = arith.constant 0 : i32
    %c0_i32_2 = arith.constant 0 : i32
    return %arg1, %c0_i32, %c0_i32_0, %c0_i32_1 : i32, i32, i32, i32
  }
  func.func @transform_4(%arg0: i32, %arg1: i32) -> (i32, i32, i32) {
    %c0_i32 = arith.constant 0 : i32
    %c0_i32_0 = arith.constant 0 : i32
    %c0_i32_1 = arith.constant 0 : i32
    return %arg1, %c0_i32, %c0_i32_0 : i32, i32, i32
  }
  func.func @transform_5(%arg0: i32, %arg1: i32) -> (i32, i32, i32, i32) {
    %c0_i32 = arith.constant 0 : i32
    %c0_i32_0 = arith.constant 0 : i32
    %c0_i32_1 = arith.constant 0 : i32
    %c0_i32_2 = arith.constant 0 : i32
    return %arg1, %c0_i32, %c0_i32_0, %c0_i32_1 : i32, i32, i32, i32
  }
  func.func @transform_6(%arg0: i32, %arg1: i32) -> (i32, i32, i32) {
    %c0_i32 = arith.constant 0 : i32
    %c0_i32_0 = arith.constant 0 : i32
    %c0_i32_1 = arith.constant 0 : i32
    return %arg1, %c0_i32, %c0_i32_0 : i32, i32, i32
  }
  func.func @transform_7(%arg0: i32, %arg1: i32) -> (i32, i32, i32, i32) {
    %c0_i32 = arith.constant 0 : i32
    %c0_i32_0 = arith.constant 0 : i32
    %c0_i32_1 = arith.constant 0 : i32
    %c0_i32_2 = arith.constant 0 : i32
    return %arg0, %c0_i32, %c0_i32_0, %c0_i32_1 : i32, i32, i32, i32
  }
}

</mosaic_0001>

<bundles_post_ra>
// kernel: tpu_custom_call.1
= control target key start
LH: loop header
LB: loop body
LE: loop exit
PB: predicated region body
PF: predicated region fallthrough
CT: control target
= control target key end

     0   :  { %12 = vsyncpa [#allocation5], 0  ;;  %s4400_s0 = inlined_call_operand.vmem [shape: f32[2,8,8,8], index: 0, kind: input, shape index: {}]   ;;  %s4401_s1 = inlined_call_operand.vmem [shape: bf16[2,7,8,16], index: 1, kind: input, shape index: {}]   ;;  %s4402_s2 = inlined_call_operand.vmem [shape: f32[2,1,16], index: 2, kind: input, shape index: {}]   ;;  %s4403_s3 = inlined_call_operand.vmem [shape: bf16[2,7,16,8], index: 3, kind: input, shape index: {}]   ;;  %s4404_s4 = inlined_call_operand.vmem [shape: f32[2,1,8], index: 4, kind: input, shape index: {}]   ;;  %s4405_s5 = inlined_call_operand.vmem [shape: bf16[2,7,16,8], index: 5, kind: input, shape index: {}]   ;;  %s4406_s6 = inlined_call_operand.vmem [shape: f32[2,1,8], index: 6, kind: input, shape index: {}]   ;;  %s4407_s7 = inlined_call_operand.hbm [shape: f32[2,8,8,8], index: 7, kind: output, shape index: {}]  }
   0x1   :  { %14 = vsyncpa [#allocation5 + $0x1], 0  ;;  %s3801_s24 = smov 0   ;;  %s3803_s25 = smov 0  }
   0x2   :  { %s3805_s26 = smov 0   ;;  %s3807_s27 = smov 0  }
   0x3   :  { %s3809_s28 = smov 0   ;;  %s3811_s29 = smov 0  }
   0x4   :  { %s3813_s30 = smov 0   ;;  %s3815_s8 = smov 0  }
   0x5 LB: > { %4417 = sst [smem:[#allocation7_spill]] %s3727_s24  ;;  %s2865_s9 = sadd.s32 4294967295, %s3755_s8   ;;  %s3755_s8 = sphi %s3815_s8, %s20_s8   ;;  %s3751_s30 = sphi %s3813_s30, %s4438_s30   ;;  %s3747_s29 = sphi %s3811_s29, %s4437_s29   ;;  %s3743_s28 = sphi %s3809_s28, %s4436_s28   ;;  %s3739_s27 = sphi %s3807_s27, %s4435_s27   ;;  %s3735_s26 = sphi %s3805_s26, %s4434_s26   ;;  %s3731_s25 = sphi %s3803_s25, %s4440_s25   ;;  %s3727_s24 = sphi %s3801_s24, %s4439_s24  }
   0x6   : > { %4418 = sst [smem:[#allocation8_spill]] %s3735_s26  ;;  %s2866_s10 = sadd.s32 4294967294, %s3755_s8  }
   0x7   : > { %4419 = sst [smem:[#allocation9_spill]] %s3747_s29  ;;  %s29_s11 = sadd.s32 1, %s3747_s29 }
   0x8   : > { %4420 = sst [smem:[#allocation10_spill]] %s3751_s30  ;;  %p30_p0 = scmp.ge.s32.totalorder %s29_s11, 2 }
   0x9   : > { %4421 = sst [smem:[#allocation11_spill]] %s3755_s8  ;;  %s32_s12 = sadd.s32 1, %s3751_s30 }
   0xa   : > { %p231_p1 = scmp.ne.s32.totalorder %s3735_s26, %s3731_s25  ;;  %p232_p2 = scmp.eq.s32.totalorder %s2865_s9, 3 }
   0xb   : > { %s4442_s11 = smov (%p30_p0, %s29_s11), 0  ;;  %s4444_s12 = smov (!%p30_p0, %s32_s12), %s3751_s30 }
   0xc   : > { %4422 = sst [smem:[#allocation12_spill]] %s4442_s11  ;;  %p3850_p3 = por %p232_p2, %p231_p1 }
   0xd   : > { %p237_p4 = scmp.ne.s32.totalorder %s3731_s25, %s3727_s24  ;;  %p34_p5 = scmp.ge.s32.totalorder %s4444_s12, 2 }
   0xe   : > { %p238_p6 = scmp.eq.s32.totalorder %s2866_s10, 3  ;;  %p2869_p7 = scmp.ge.s32.totalorder %s3755_s8, 1 }
   0xf   : > { %p306_p8 = scmp.lt.s32.totalorder %s3755_s8, 5  ;;  %s4446_s12 = smov (%p34_p5, %s4444_s12), 0 }
  0x10   : > { %4424 = sst [smem:[#allocation13_spill]] %s4446_s12  ;;  %p3860_p9 = por %p238_p6, %p237_p4 }
  0x11   : > { %p307_p10 = pnand %p2869_p7, %p306_p8  ;;  %s218_s15 = ssub.s32 %s3751_s30, %s4446_s12 }
  0x12   : > { %s4425_s14 = scalar_select %p3860_p9, 1, 0 }
  0x13   : > { %s221_s16 = sadd.s32 1, %s3735_s26  ;;  %p219_p11 = scmp.eq.s32.totalorder %s218_s15, 0 }
  0x14   : > { %4426 = sst [smem:[#allocation14_spill]] %s4425_s14  ;;  %310 = sbr.rel (%p307_p10) target bundleno = 871 (0x367), region = 48 }
  0x15   : > { %s3868_s17 = scalar_select %p219_p11, %s3735_s26, %s221_s16  }
  0x16   : > { %s4409_s18 = sand.u32 (!%p307_p10), 1, %s3731_s25   ;;  %p362_p12 = scmp.lt.s32.totalorder (!%p307_p10), %s3743_s28, 1 }
  0x17   : > { %4427 = sst [smem:[#allocation15_spill]] %s3868_s17  ;;  %s2870_s19 = sshll.u32 (!%p307_p10), %s4409_s18, 6 }
  0x18   : > { %p367_p13 = scmp.lt.s32.totalorder (!%p307_p10), %s3739_s27, 1  ;;  %s3913_s30 = scalar_lea.vmem (!%p307_p10), [#allocation4], %s2870_s19 }
  0x19   : > { %p2876_p0 = scmp.ne.s32.totalorder (!%p307_p10), %s3739_s27, 0 }
  0x1b   : > { %s363_s20 = scalar_select %p362_p12, %s3743_s28, 1 }
  0x1c   : > { %s3877_s21 = scalar_select %p367_p13, %s3739_s27, 1 }
  0x1d   : > { %s3029_s22 = sshll.u32 %s363_s20, 6  ;;  %395 = sbr.rel (%p2876_p0) target bundleno = 55 (0x37), region = 52  ;;  %vm396_vm0 = vcmask (!%p2876_p0), 64512   ;;  %vm398_vm1 = vcmask (!%p2876_p0), 58368   ;;  %vm402_vm2 = vcmask (!%p2876_p0), 130048   ;;  %v3757_v2 = vmov (!%p2876_p0), 0.0  }
  0x1e   : > { %s3882_s10 = scalar_lea.vmem %s4400_s0, %s3029_s22  ;;  %s3499_s15 = smul.u32 28, %s3877_s21  ;;  %397 = vst.msk [vmem:[#allocation2] sm:$0xff] (!%p2876_p0), %vm396_vm0, %v3757_v2  ;;  %400 = vst.msk [vmem:[#allocation2 + $0x10] sm:$0xff] (!%p2876_p0), %vm396_vm0, %v3757_v2  ;;  %vm404_vm3 = vcmask (!%p2876_p0), 123904   ;;  %vm409_vm4 = vcmask (!%p2876_p0), 57344   ;;  %vm427_vm5 = vcmask (!%p2876_p0), 122880  }
  0x1f   : > { %s3500_s11 = smul.u32 56, %s3877_s21  ;;  %s382_s20 = scalar_lea.vmem %s4404_s4, %s3877_s21  ;;  %v444_v0 = vld [vmem:[%s3882_s10] sm:$0xff] (!%p2876_p0)  ;;  %v445_v1 = vld [vmem:[%s3882_s10 + $0x8] sm:$0xff] (!%p2876_p0)  ;;  %399 = vst.msk [vmem:[#allocation2 + $0x8] sm:$0x3] (!%p2876_p0), %vm398_vm1, %v3757_v2  ;;  %v446_v3 = vld [vmem:[%s3882_s10 + $0x10] sm:$0xff] (!%p2876_p0) }
  0x20   : > { %s3893_s17 = scalar_lea.vmem %s4401_s1, %s3499_s15  ;;  %s390_s29 = scalar_lea.vmem %s4406_s6, %s3877_s21  ;;  %401 = vst.msk [vmem:[#allocation2 + $0x18] sm:$0x3] (!%p2876_p0), %vm398_vm1, %v3757_v2  ;;  %v447_v4 = vld [vmem:[%s3882_s10 + $0x18] sm:$0xff] (!%p2876_p0)  ;;  %v448_v5 = vld [vmem:[%s3882_s10 + $0x20] sm:$0xff] (!%p2876_p0)  ;;  %v449_v6 = vld [vmem:[%s3882_s10 + $0x28] sm:$0xff] (!%p2876_p0) }
  0x21   : > { %s3902_s22 = scalar_lea.vmem %s4403_s3, %s3500_s11  ;;  %s3907_s12 = scalar_lea.vmem %s4405_s5, %s3500_s11  ;;  %403 = vst.msk [vmem:[#allocation3] sm:$0xff] (!%p2876_p0), %vm402_vm2, %v3757_v2  ;;  %406 = vst.msk [vmem:[#allocation3 + $0x10] sm:$0xff] (!%p2876_p0), %vm402_vm2, %v3757_v2  ;;  %v450_v7 = vld [vmem:[%s3882_s10 + $0x30] sm:$0xff] (!%p2876_p0)  ;;  %v451_v8 = vld [vmem:[%s3882_s10 + $0x38] sm:$0xff] (!%p2876_p0) }
  0x22   : > { %452 = vst.msk [vmem:[%s3913_s30] sm:$0xff] (!%p2876_p0), %vm396_vm0, %v444_v0  ;;  %453 = vst.msk [vmem:[%s3913_s30 + $0x8] sm:$0xff] (!%p2876_p0), %vm396_vm0, %v445_v1 }
  0x23   : > { %405 = vst.msk [vmem:[#allocation3 + $0x8] sm:$0x3] (!%p2876_p0), %vm404_vm3, %v3757_v2  ;;  %407 = vst.msk [vmem:[#allocation3 + $0x18] sm:$0x3] (!%p2876_p0), %vm404_vm3, %v3757_v2 }
  0x24   : > { %410 = vst.msk [vmem:[#allocation2 + $0x20] sm:$0x1] %vm409_vm4, %v3757_v2  ;;  %411 = vst.msk [vmem:[#allocation2 + $0x30] sm:$0x1] %vm409_vm4, %v3757_v2 }
  0x25   : > { %412 = vst.msk [vmem:[#allocation2 + $0x40] sm:$0x1] %vm409_vm4, %v3757_v2  ;;  %413 = vst.msk [vmem:[#allocation2 + $0x50] sm:$0x1] %vm409_vm4, %v3757_v2 }
  0x26   : > { %414 = vst.msk [vmem:[#allocation2 + $0x60] sm:$0x1] %vm409_vm4, %v3757_v2  ;;  %415 = vst.msk [vmem:[#allocation2 + $0x70] sm:$0x1] %vm409_vm4, %v3757_v2 }
  0x27   : > { %416 = vst.msk [vmem:[#allocation2 + $0x80] sm:$0x1] %vm409_vm4, %v3757_v2  ;;  %417 = vst.msk [vmem:[#allocation2 + $0x90] sm:$0x1] %vm409_vm4, %v3757_v2 }
  0x28   : > { %418 = vst.msk [vmem:[#allocation2 + $0x29] sm:$0x1] %vm409_vm4, %v3757_v2  ;;  %419 = vst.msk [vmem:[#allocation2 + $0x39] sm:$0x1] %vm409_vm4, %v3757_v2 }
  0x29   : > { %420 = vst.msk [vmem:[#allocation2 + $0x49] sm:$0x1] %vm409_vm4, %v3757_v2  ;;  %421 = vst.msk [vmem:[#allocation2 + $0x59] sm:$0x1] %vm409_vm4, %v3757_v2 }
  0x2a   : > { %422 = vst.msk [vmem:[#allocation2 + $0x69] sm:$0x1] %vm409_vm4, %v3757_v2  ;;  %423 = vst.msk [vmem:[#allocation2 + $0x79] sm:$0x1] %vm409_vm4, %v3757_v2 }
  0x2b   : > { %424 = vst.msk [vmem:[#allocation2 + $0x89] sm:$0x1] %vm409_vm4, %v3757_v2 }
  0x2c   : > { %428 = vst.msk [vmem:[#allocation3 + $0x20] sm:$0x1] %vm427_vm5, %v3757_v2  ;;  %429 = vst.msk [vmem:[#allocation3 + $0x30] sm:$0x1] %vm427_vm5, %v3757_v2 }
  0x2d   : > { %430 = vst.msk [vmem:[#allocation3 + $0x40] sm:$0x1] %vm427_vm5, %v3757_v2  ;;  %431 = vst.msk [vmem:[#allocation3 + $0x50] sm:$0x1] %vm427_vm5, %v3757_v2 }
  0x2e   : > { %432 = vst.msk [vmem:[#allocation3 + $0x60] sm:$0x1] %vm427_vm5, %v3757_v2  ;;  %433 = vst.msk [vmem:[#allocation3 + $0x70] sm:$0x1] %vm427_vm5, %v3757_v2 }
  0x2f   : > { %434 = vst.msk [vmem:[#allocation3 + $0x80] sm:$0x1] %vm427_vm5, %v3757_v2  ;;  %435 = vst.msk [vmem:[#allocation3 + $0x90] sm:$0x1] %vm427_vm5, %v3757_v2 }
  0x30   : > { %436 = vst.msk [vmem:[#allocation3 + $0x29] sm:$0x1] %vm427_vm5, %v3757_v2  ;;  %437 = vst.msk [vmem:[#allocation3 + $0x39] sm:$0x1] %vm427_vm5, %v3757_v2 }
  0x31   : > { %438 = vst.msk [vmem:[#allocation3 + $0x49] sm:$0x1] %vm427_vm5, %v3757_v2  ;;  %439 = vst.msk [vmem:[#allocation3 + $0x59] sm:$0x1] %vm427_vm5, %v3757_v2 }
  0x32   : > { %440 = vst.msk [vmem:[#allocation3 + $0x69] sm:$0x1] %vm427_vm5, %v3757_v2  ;;  %441 = vst.msk [vmem:[#allocation3 + $0x79] sm:$0x1] %vm427_vm5, %v3757_v2 }
  0x33   : > { %442 = vst.msk [vmem:[#allocation3 + $0x89] sm:$0x1] %vm427_vm5, %v3757_v2 }
  0x34   : > { %454 = vst.msk [vmem:[%s3913_s30 + $0x10] sm:$0xff] %vm396_vm0, %v446_v3  ;;  %455 = vst.msk [vmem:[%s3913_s30 + $0x18] sm:$0xff] %vm396_vm0, %v447_v4 }
  0x35   : > { %456 = vst.msk [vmem:[%s3913_s30 + $0x20] sm:$0xff] %vm396_vm0, %v448_v5  ;;  %457 = vst.msk [vmem:[%s3913_s30 + $0x28] sm:$0xff] %vm396_vm0, %v449_v6 }
  0x36   : > { %458 = vst.msk [vmem:[%s3913_s30 + $0x30] sm:$0xff] %vm396_vm0, %v450_v7  ;;  %459 = vst.msk [vmem:[%s3913_s30 + $0x38] sm:$0xff] %vm396_vm0, %v451_v8 }
  0x37 PF: > { %v2885_v9 = vld [vmem:[%s3893_s17 + $0x4] sm:$0xf]  ;;  %vm565_vm6 = vcmask 1043456   ;;  %v3979_v14 = vld [vmem:[%s3893_s17] sm:$0xf]  ;;  %vm517_vm7 = vcmask 64512   ;;  %s4428_s27 = scalar_lea.vmem %s4402_s2, %s3877_s21 }
  0x38   : > { %3492 = vmatprep.subr.msk.bf16.mxu0 %vm565_vm6, %v2885_v9  ;;  %v567_v12 = vsel %vm565_vm6, %v2885_v9, 0  ;;  %v647_v2 = vsel %vm565_vm6, %v3979_v14, 0  ;;  %v2894_v5 = vld [vmem:[%s3893_s17 + $0x8] sm:$0xf]  ;;  %v526_v9 = vld [vmem:[#allocation2] sm:$0xff]  ;;  %vm1289_vm0 = vcmask 130048  }
  0x39   : > { %v539_v10 = vld [vmem:[#allocation2 + $0x1] sm:$0xff]  ;;  %3137 = vmatpush3.bf16.msra.mxu0 %v567_v12  ;;  %s3030_s18 = sshll.u32 %s3743_s28, 10  ;;  %s2729_s19 = sshll.u32 %s3913_s30, 4  ;;  %s4337_s19 = int_to_ptr.vmem [resolvable:$true] %s2729_s19 }
  0x3a   : > { %v3973_v11 = vld [vmem:[#allocation2 + $0x11] sm:$0xff]  ;;  %3493 = vmatprep.subr.msk.bf16.mxu0 %vm565_vm6, %v3979_v14  ;;  %s4335_s28 = scalar_lea.hbm %s4407_s7, %s3030_s18  ;;  %s4429_s15 = sand.u32 1, %s3731_s25  }
  0x3b   : > { %v547_v13 = vpack.c.bf16 %v3973_v11, %v539_v10  ;;  %v462_v19 = vld [vmem:[%s3913_s30 + $0x10] sm:$0xff]  ;;  %v463_v20 = vld [vmem:[%s3913_s30 + $0x18] sm:$0xff]  ;;  %s3758_s23 = smov [#allocation4]  }
  0x3c   : > { %v460_v15 = vld [vmem:[%s3913_s30] sm:$0xff]  ;;  %v461_v16 = vld [vmem:[%s3913_s30 + $0x8] sm:$0xff]  ;;  %v478_v21 = vmin.f32 %v462_v19, 0.0  ;;  %v479_v26 = vmin.f32 %v463_v20, 0.0  ;;  %vm470_vm10 = vcmp.gt.f32.partialorder %v462_v19, 0.0  ;;  %vm471_vm11 = vcmp.gt.f32.partialorder %v463_v20, 0.0 }
  0x3d   : > { %v476_v17 = vmin.f32 %v460_v15, 0.0  ;;  %v477_v18 = vmin.f32 %v461_v16, 0.0  ;;  %3138 = vmatprep.mubr.msk.bf16.mxu0 %vm517_vm7, %v547_v13  ;;  %v464_v22 = vld [vmem:[%s3913_s30 + $0x20] sm:$0xff]  ;;  %v465_v23 = vld [vmem:[%s3913_s30 + $0x28] sm:$0xff]  ;;  %v466_v33 = vld [vmem:[%s3913_s30 + $0x30] sm:$0xff]  ;;  %vm468_vm8 = vcmp.gt.f32.partialorder %v460_v15, 0.0 }
  0x3e   : > { %v488_v27 = vmul.f32 1.442695, %v478_v21  ;;  %v480_v28 = vmin.f32 %v464_v22, 0.0  ;;  %v481_v29 = vmin.f32 %v465_v23, 0.0  ;;  %v490_v30 = vmul.f32 1.442695, %v479_v26 }
  0x3f   : > { %v484_v24 = vmul.f32 1.442695, %v476_v17  ;;  %v486_v25 = vmul.f32 1.442695, %v477_v18  ;;  %v482_v34 = vmin.f32 %v466_v33, 0.0  ;;  %v467_v35 = vld [vmem:[%s3913_s30 + $0x38] sm:$0xff] }
  0x40   : > { %v492_v31 = vmul.f32 1.442695, %v480_v28  ;;  %v494_v32 = vmul.f32 1.442695, %v481_v29  ;;  %v483_v36 = vmin.f32 %v467_v35, 0.0  ;;  %vm469_vm9 = vcmp.gt.f32.partialorder %v461_v16, 0.0 }
  0x41   : > { %3589 = vpow2.f32 %v484_v24  ;;  %v496_v37 = vmul.f32 1.442695, %v482_v34  ;;  %vm472_vm12 = vcmp.gt.f32.partialorder %v464_v22, 0.0  ;;  %vm473_vm13 = vcmp.gt.f32.partialorder %v465_v23, 0.0  ;;  %v527_v10 = vld [vmem:[#allocation2 + $0x10] sm:$0xff]  ;;  %v714_v24 = vld [vmem:[#allocation2 + $0x2] sm:$0xff] }
  0x42   : > { %3591 = vpow2.f32 %v486_v25  ;;  %v498_v38 = vmul.f32 1.442695, %v483_v36  ;;  %vm474_vm14 = vcmp.gt.f32.partialorder %v466_v33, 0.0  ;;  %vm475_vm15 = vcmp.gt.f32.partialorder %v467_v35, 0.0  ;;  %v2899_v21 = vld [vmem:[%s3893_s17 + $0xc] sm:$0xf] }
  0x43   : > { %3593 = vpow2.f32 %v488_v27  ;;  %v534_v13 = vpack.c.bf16 %v527_v10, %v526_v9  ;;  %v715_v25 = vld [vmem:[#allocation2 + $0x12] sm:$0xff]  ;;  %v844_v34 = vsel %vm565_vm6, %v2899_v21, 0  ;;  %s3665_s9 = sshll.u32 %s3758_s23, 4  ;;  %s3666_s9 = int_to_ptr.vmem [resolvable:$false] %s3665_s9 }
  0x44   : > { %3595 = vpow2.f32 %v490_v30  ;;  %v722_v27 = vpack.c.bf16 %v715_v25, %v714_v24  ;;  %p3668_p5 = scmp.lt.s32.totalorder %s4337_s19, %s3666_s9 }
  0x45   : > { %3597 = vpow2.f32 %v492_v31 }
  0x46   : > { %3599 = vpow2.f32 %v494_v32 }
  0x47   : > { %3601 = vpow2.f32 %v496_v37 }
  0x48   : > { %3603 = vpow2.f32 %v498_v38 }
  0x4b   : > { %v3590_v39 = vpop.eup %3589 }
  0x4c   : > { %v3592_v40 = vpop.eup %3591  ;;  %v2877_v41 = vadd.f32 -1.0, %v3590_v39 }
  0x4d   : > { %v3594_v42 = vpop.eup %3593  ;;  %v2878_v43 = vadd.f32 -1.0, %v3592_v40 }
  0x4e   : > { %v3596_v44 = vpop.eup %3595  ;;  %v508_v45 = vsel %vm468_vm8, %v460_v15, %v2877_v41  ;;  %v2879_v46 = vadd.f32 -1.0, %v3594_v42 }
  0x4f   : > { %v3598_v47 = vpop.eup %3597  ;;  %v509_v48 = vsel %vm469_vm9, %v461_v16, %v2878_v43  ;;  %518 = vst.msk [vmem:[#allocation2 + $0x21] sm:$0xff] %vm517_vm7, %v508_v45  ;;  %v2880_v49 = vadd.f32 -1.0, %v3596_v44  ;;  %v2909_v43 = vld [vmem:[%s3893_s17 + $0x14] sm:$0xf] }
  0x50   : > { %v3600_v50 = vpop.eup %3599  ;;  %519 = vst.msk [vmem:[#allocation2 + $0x31] sm:$0xff] %vm517_vm7, %v509_v48  ;;  %v510_v51 = vsel %vm470_vm10, %v462_v19, %v2879_v46  ;;  %v2881_v52 = vadd.f32 -1.0, %v3598_v47 }
  0x51   : > { %v511_v53 = vsel %vm471_vm11, %v463_v20, %v2880_v49  ;;  %520 = vst.msk [vmem:[#allocation2 + $0x41] sm:$0xff] %vm517_vm7, %v510_v51  ;;  %v2882_v54 = vadd.f32 -1.0, %v3600_v50  ;;  %v3602_v55 = vpop.eup %3601  ;;  %v741_v20 = vsel %vm565_vm6, %v2894_v5, 0  ;;  %v1048_v49 = vsel %vm565_vm6, %v2909_v43, 0  ;;  %v2914_v50 = vld [vmem:[%s3893_s17 + $0x18] sm:$0xf] }
  0x52   : > { %521 = vst.msk [vmem:[#allocation2 + $0x51] sm:$0xff] %vm517_vm7, %v511_v53  ;;  %v512_v56 = vsel %vm472_vm12, %v464_v22, %v2881_v52  ;;  %v3604_v57 = vpop.eup %3603  ;;  %v2883_v59 = vadd.f32 -1.0, %v3602_v55  ;;  %v1150_v55 = vsel %vm565_vm6, %v2914_v50, 0 }
  0x53   : > { %v513_v58 = vsel %vm473_vm13, %v465_v23, %v2882_v54  ;;  %522 = vst.msk [vmem:[#allocation2 + $0x61] sm:$0xff] %vm517_vm7, %v512_v56  ;;  %v2884_v60 = vadd.f32 -1.0, %v3604_v57 }
  0x54   : > { %523 = vst.msk [vmem:[#allocation2 + $0x71] sm:$0xff] %vm517_vm7, %v513_v58  ;;  %v514_v61 = vsel %vm474_vm14, %v466_v33, %v2883_v59 }
  0x55   : > { %524 = vst.msk [vmem:[#allocation2 + $0x81] sm:$0xff] %vm517_vm7, %v514_v61  ;;  %v515_v63 = vsel %vm475_vm15, %v467_v35, %v2884_v60  ;;  %v2904_v35 = vld [vmem:[%s3893_s17 + $0x10] sm:$0xf]  ;;  %v3575_v60 = vld [vmem:[%s3902_s22 + $0x8] sm:$0xff]  }
  0x56   : > { %v3998_v62 = vld [vmem:[#allocation2 + $0x21] sm:$0xff]  ;;  %525 = vst.msk [vmem:[#allocation2 + $0x91] sm:$0xff] %vm517_vm7, %v515_v63  ;;  %v946_v42 = vsel %vm565_vm6, %v2904_v35, 0  ;;  %v4078_v61 = vld [vmem:[#allocation3 + $0x11] sm:$0xff] }
  0x57   : > { %v4001_v0 = vld [vmem:[#allocation2 + $0x31] sm:$0xff]  ;;  %v528_v14 = vld [vmem:[#allocation2 + $0x20] sm:$0xff]  ;;  %v927_v46 = vpack.c.bf16 %v3998_v62, %v3973_v11 }
  0x58   : > { %v548_v1 = vpack.c.bf16 %v4001_v0, %v3998_v62  ;;  %v4008_v3 = vld [vmem:[#allocation2 + $0x41] sm:$0xff]  ;;  %v529_v15 = vld [vmem:[#allocation2 + $0x30] sm:$0xff]  ;;  %v825_v39 = vpack.c.bf16 %v528_v14, %v527_v10 }
  0x59   : > { %v4010_v4 = vld [vmem:[#allocation2 + $0x51] sm:$0xff]  ;;  %v530_v16 = vld [vmem:[#allocation2 + $0x40] sm:$0xff]  ;;  %v4026_v18 = vpack.c.bf16 %v529_v15, %v528_v14  ;;  %v928_v47 = vpack.c.bf16 %v4008_v3, %v4001_v0 }
  0x5a   : > { %3139 = vmatmul.mubr.msk.bf16.vlgmr.msra.gmra.mrb[0].mxu0 %vm517_vm7, %v548_v1  ;;  %v549_v6 = vpack.c.bf16 %v4010_v4, %v4008_v3  ;;  %v4016_v7 = vld [vmem:[#allocation2 + $0x61] sm:$0xff]  ;;  %v531_v17 = vld [vmem:[#allocation2 + $0x50] sm:$0xff]  ;;  %v826_v40 = vpack.c.bf16 %v530_v16, %v529_v15  ;;  %v2919_v3 = vld [vmem:[%s4428_s27] ss:$0 sm:$0xff] }
  0x5b   : > { %3147 = vmatpush3.bf16.msra.mxu0 %v647_v2  ;;  %v4018_v8 = vld [vmem:[#allocation2 + $0x71] sm:$0xff]  ;;  %v4028_v19 = vpack.c.bf16 %v531_v17, %v530_v16  ;;  %v532_v22 = vld [vmem:[#allocation2 + $0x60] sm:$0xff]  ;;  %v929_v48 = vpack.c.bf16 %v4016_v7, %v4010_v4  ;;  %v4095_v2 = vld [vmem:[%s3907_s12 + $0x8] sm:$0xff]  }
  0x5c   : > { %3142 = vmatprep.mubr.msk.bf16.mxu0 %vm517_vm7, %v549_v6  ;;  %3494 = vmatprep.subr.msk.bf16.mxu0 %vm565_vm6, %v2894_v5  ;;  %v550_v12 = vpack.c.bf16 %v4018_v8, %v4016_v7  ;;  %v533_v23 = vld [vmem:[#allocation2 + $0x70] sm:$0xff]  ;;  %v716_v28 = vld [vmem:[#allocation2 + $0x22] sm:$0xff]  ;;  %v827_v41 = vpack.c.bf16 %v532_v22, %v531_v17 }
  0x5d   : > { %v537_v26 = vpack.c.bf16 %v533_v23, %v532_v22  ;;  %v717_v29 = vld [vmem:[#allocation2 + $0x32] sm:$0xff]  ;;  %v718_v30 = vld [vmem:[#allocation2 + $0x42] sm:$0xff]  ;;  %v1029_v52 = vpack.c.bf16 %v716_v28, %v715_v25 }
  0x5e   : > { %v719_v31 = vld [vmem:[#allocation2 + $0x52] sm:$0xff]  ;;  %v723_v32 = vpack.c.bf16 %v717_v29, %v716_v28  ;;  %v720_v36 = vld [vmem:[#allocation2 + $0x62] sm:$0xff]  ;;  %v1030_v53 = vpack.c.bf16 %v718_v30, %v717_v29 }
  0x5f   : > { %v724_v33 = vpack.c.bf16 %v719_v31, %v718_v30  ;;  %v721_v37 = vld [vmem:[#allocation2 + $0x72] sm:$0xff]  ;;  %v824_v44 = vld [vmem:[#allocation2 + $0x80] sm:$0xff]  ;;  %v1031_v54 = vpack.c.bf16 %v720_v36, %v719_v31 }
  0x60   : > { %v725_v38 = vpack.c.bf16 %v721_v37, %v720_v36  ;;  %v828_v45 = vpack.c.bf16 %v824_v44, %v533_v23  ;;  %v926_v51 = vld [vmem:[#allocation2 + $0x81] sm:$0xff]  ;;  %v1130_v58 = vld [vmem:[#allocation2 + $0x90] sm:$0xff] }
  0x61   : > { %v930_v11 = vpack.c.bf16 %v926_v51, %v4018_v8  ;;  %v1028_v56 = vld [vmem:[#allocation2 + $0x82] sm:$0xff]  ;;  %v1134_v59 = vpack.c.bf16 %v1130_v58, %v824_v44  ;;  %v4089_v1 = vld [vmem:[%s3902_s22 + $0x10] sm:$0xff]  }
  0x62   : > { %3143 = vmatmul.mubr.msk.bf16.gmra.mrb[4].mxu0 %vm517_vm7, %v550_v12  ;;  %v1032_v57 = vpack.c.bf16 %v1028_v56, %v721_v37  ;;  %v1314_v62 = vld [vmem:[#allocation3 + $0x1] sm:$0xff] }
  0x63   : > { %3148 = vmatprep.mubr.msk.bf16.mxu0 %vm517_vm7, %v534_v13  ;;  %v4081_v63 = vpack.c.bf16 %v4078_v61, %v1314_v62  ;;  %v4086_v0 = vld [vmem:[%s3907_s12] sm:$0xff]  }
  0x64   : > { %3346 = vmatprep.subr.bf16.mxu1 %v4086_v0 }
  0x65   : > { %3347 = vmatpush3.bf16.msra.mxu1 %v4086_v0 }
  0x66   : > { %3246 = vmatprep.subr.bf16.mxu1 %v4089_v1 }
  0x6a   : > { %3149 = vmatmul.mubr.msk.bf16.vlgmr.msra.gmra.mrb[0].mxu0 %vm517_vm7, %v4026_v18 }
  0x6b   : > { %3157 = vmatpush3.bf16.msra.mxu0 %v741_v20  ;;  %3152 = vmatprep.mubr.msk.bf16.mxu0 %vm517_vm7, %v4028_v19 }
  0x6c   : > { %3495 = vmatprep.subr.msk.bf16.mxu0 %vm565_vm6, %v2899_v21 }
  0x72   : > { %3153 = vmatmul.mubr.msk.bf16.gmra.mrb[4].mxu0 %vm517_vm7, %v537_v26 }
  0x73   : > { %3158 = vmatprep.mubr.msk.bf16.mxu0 %vm517_vm7, %v722_v27 }
  0x7a   : > { %3159 = vmatmul.mubr.msk.bf16.vlgmr.msra.gmra.mrb[0].mxu0 %vm517_vm7, %v723_v32 }
  0x7b   : > { %3167 = vmatpush3.bf16.msra.mxu0 %v844_v34  ;;  %3162 = vmatprep.mubr.msk.bf16.mxu0 %vm517_vm7, %v724_v33 }
  0x7c   : > { %3496 = vmatprep.subr.msk.bf16.mxu0 %vm565_vm6, %v2904_v35 }
  0x82   : > { %3163 = vmatmul.mubr.msk.bf16.gmra.mrb[4].mxu0 %vm517_vm7, %v725_v38 }
  0x83   : > { %3168 = vmatprep.mubr.msk.bf16.mxu0 %vm517_vm7, %v825_v39 }
  0x8a   : > { %3169 = vmatmul.mubr.msk.bf16.vlgmr.msra.gmra.mrb[0].mxu0 %vm517_vm7, %v826_v40 }
  0x8b   : > { %3177 = vmatpush3.bf16.msra.mxu0 %v946_v42  ;;  %3172 = vmatprep.mubr.msk.bf16.mxu0 %vm517_vm7, %v827_v41 }
  0x8c   : > { %3497 = vmatprep.subr.msk.bf16.mxu0 %vm565_vm6, %v2909_v43 }
  0x92   : > { %3173 = vmatmul.mubr.msk.bf16.gmra.mrb[4].mxu0 %vm517_vm7, %v828_v45 }
  0x93   : > { %3178 = vmatprep.mubr.msk.bf16.mxu0 %vm517_vm7, %v927_v46 }
  0x9a   : > { %3179 = vmatmul.mubr.msk.bf16.vlgmr.msra.gmra.mrb[0].mxu0 %vm517_vm7, %v928_v47 }
  0x9b   : > { %3187 = vmatpush3.bf16.msra.mxu0 %v1048_v49  ;;  %3182 = vmatprep.mubr.msk.bf16.mxu0 %vm517_vm7, %v929_v48 }
  0x9c   : > { %3498 = vmatprep.subr.msk.bf16.mxu0 %vm565_vm6, %v2914_v50 }
  0xa2   : > { %3183 = vmatmul.mubr.msk.bf16.gmra.mrb[4].mxu0 %vm517_vm7, %v930_v11 }
  0xa3   : > { %3188 = vmatprep.mubr.msk.bf16.mxu0 %vm517_vm7, %v1029_v52 }
  0xaa   : > { %3189 = vmatmul.mubr.msk.bf16.vlgmr.msra.gmra.mrb[0].mxu0 %vm517_vm7, %v1030_v53 }
  0xab   : > { %3197 = vmatpush3.bf16.msra.mxu0 %v1150_v55  ;;  %3192 = vmatprep.mubr.msk.bf16.mxu0 %vm517_vm7, %v1031_v54 }
  0xac   : > { %3206 = vmatprep.subr.bf16.mxu0 %v3575_v60 }
  0xb2   : > { %3193 = vmatmul.mubr.msk.bf16.gmra.mrb[4].mxu0 %vm517_vm7, %v1032_v57 }
  0xb3   : > { %3198 = vmatprep.mubr.msk.bf16.mxu0 %vm517_vm7, %v4026_v18 }
  0xba   : > { %3199 = vmatmul.mubr.msk.bf16.vlgmr.msra.gmra.mrb[0].mxu0 %vm517_vm7, %v4028_v19 }
  0xbb   : > { %3202 = vmatprep.mubr.msk.bf16.mxu0 %vm517_vm7, %v537_v26  ;;  %3207 = vmatpush3.bf16.msra.mxu0 %v3575_v60 }
  0xbc   : > { %3216 = vmatprep.subr.bf16.mxu0 %v4095_v2 }
  0xc2   : > { %3203 = vmatmul.mubr.msk.bf16.gmra.mrb[4].mxu0 %vm517_vm7, %v1134_v59 }
  0xc3   : > { %3208 = vmatprep.mubr.msk.bf16.mxu0 %vm1289_vm0, %v4081_v63 }
 0x18d   : > { %v3200_v4 = vpop.f32.mrb[0].mxu0 }
 0x18e   : > { %v1234_v5 = vadd.f32 %v3200_v4, %v2919_v3  ;;  %v1186_v6 = vpop.f32.mrb[1].mxu0 }
 0x18f   : > { %v1232_v7 = vadd.f32 %v2919_v3, %v1186_v6  ;;  %v3201_v8 = vpop.f32.mrb[2].mxu0 }
 0x190   : > { %v1250_v9 = vmin.f32 %v1234_v5, 0.0  ;;  %v1235_v10 = vadd.f32 %v3201_v8, %v2919_v3  ;;  %v1189_v12 = vpop.f32.mrb[3].mxu0  ;;  %vm1242_vm1 = vcmp.gt.f32.partialorder %v1234_v5, 0.0 }
 0x191   : > { %v1248_v13 = vmin.f32 %v1232_v7, 0.0  ;;  %v1233_v14 = vadd.f32 %v2919_v3, %v1189_v12  ;;  %vm1240_vm2 = vcmp.gt.f32.partialorder %v1232_v7, 0.0  ;;  %v3580_v12 = vld [vmem:[%s3902_s22] sm:$0xff]  }
 0x192   : > { %v1260_v15 = vmul.f32 1.442695, %v1250_v9  ;;  %v1251_v16 = vmin.f32 %v1235_v10, 0.0  ;;  %vm1243_vm3 = vcmp.gt.f32.partialorder %v1235_v10, 0.0 }
 0x193   : > { %v1256_v17 = vmul.f32 1.442695, %v1248_v13  ;;  %v1249_v18 = vmin.f32 %v1233_v14, 0.0  ;;  %vm1241_vm4 = vcmp.gt.f32.partialorder %v1233_v14, 0.0 }
 0x194   : > { %3605 = vpow2.f32 %v1260_v15  ;;  %v1262_v19 = vmul.f32 1.442695, %v1251_v16  ;;  %v1640_v16 = vld [vmem:[#allocation3 + $0x2] sm:$0xff] }
 0x195   : > { %3607 = vpow2.f32 %v1256_v17  ;;  %v1258_v20 = vmul.f32 1.442695, %v1249_v18  ;;  %v3204_v21 = vpop.f32.mrb[4].mxu0 }
 0x196   : > { %3609 = vpow2.f32 %v1262_v19  ;;  %v1238_v22 = vadd.f32 %v3204_v21, %v2919_v3  ;;  %v1202_v23 = vpop.f32.mrb[5].mxu0 }
 0x197   : > { %3611 = vpow2.f32 %v1258_v20  ;;  %v1236_v24 = vadd.f32 %v2919_v3, %v1202_v23  ;;  %v3205_v25 = vpop.f32.mrb[6].mxu0  ;;  %v4132_v20 = vld [vmem:[#allocation3 + $0x12] sm:$0xff] }
 0x198   : > { %v1254_v26 = vmin.f32 %v1238_v22, 0.0  ;;  %v1239_v27 = vadd.f32 %v3205_v25, %v2919_v3  ;;  %v1205_v28 = vpop.f32.mrb[7].mxu0  ;;  %vm1246_vm5 = vcmp.gt.f32.partialorder %v1238_v22, 0.0 }
 0x199   : > { %v1252_v29 = vmin.f32 %v1236_v24, 0.0  ;;  %v1237_v30 = vadd.f32 %v2919_v3, %v1205_v28  ;;  %vm1244_vm6 = vcmp.gt.f32.partialorder %v1236_v24, 0.0  ;;  %v3579_v28 = vld [vmem:[%s3907_s12 + $0x10] sm:$0xff]  }
 0x19a   : > { %v1268_v31 = vmul.f32 1.442695, %v1254_v26  ;;  %v1255_v32 = vmin.f32 %v1239_v27, 0.0  ;;  %vm1247_vm8 = vcmp.gt.f32.partialorder %v1239_v27, 0.0 }
 0x19b   : > { %v1264_v33 = vmul.f32 1.442695, %v1252_v29  ;;  %v1253_v34 = vmin.f32 %v1237_v30, 0.0  ;;  %vm1245_vm9 = vcmp.gt.f32.partialorder %v1237_v30, 0.0 }
 0x19c   : > { %3613 = vpow2.f32 %v1268_v31  ;;  %v1270_v35 = vmul.f32 1.442695, %v1255_v32  ;;  %v3581_v31 = vld [vmem:[%s3902_s22 + $0x18] sm:$0xff]  }
 0x19d   : > { %3615 = vpow2.f32 %v1264_v33  ;;  %v1266_v36 = vmul.f32 1.442695, %v1253_v34  ;;  %v1299_v33 = vld [vmem:[#allocation3 + $0x10] sm:$0xff] }
 0x19e   : > { %v3606_v37 = vpop.eup %3605  ;;  %3617 = vpow2.f32 %v1270_v35 }
 0x19f   : > { %v3608_v38 = vpop.eup %3607  ;;  %v2922_v39 = vadd.f32 -1.0, %v3606_v37  ;;  %3619 = vpow2.f32 %v1266_v36 }
 0x1a0   : > { %v3610_v40 = vpop.eup %3609  ;;  %v2920_v41 = vadd.f32 -1.0, %v3608_v38 }
 0x1a1   : > { %v3612_v42 = vpop.eup %3611  ;;  %v1282_v43 = vsel %vm1242_vm1, %v1234_v5, %v2922_v39  ;;  %v2923_v44 = vadd.f32 -1.0, %v3610_v40  ;;  %v3582_v39 = vld [vmem:[%s3907_s12 + $0x18] sm:$0xff]  }
 0x1a2   : > { %1292 = vst.msk [vmem:[#allocation3 + $0x41] sm:$0xff] %vm1289_vm0, %v1282_v43  ;;  %v1280_v45 = vsel %vm1240_vm2, %v1232_v7, %v2920_v41  ;;  %v2921_v46 = vadd.f32 -1.0, %v3612_v42  ;;  %v3583_v42 = vld [vmem:[%s3902_s22 + $0x20] sm:$0xff]  }
 0x1a3   : > { %1290 = vst.msk [vmem:[#allocation3 + $0x21] sm:$0xff] %vm1289_vm0, %v1280_v45  ;;  %v1283_v47 = vsel %vm1243_vm3, %v1235_v10, %v2923_v44  ;;  %v3584_v45 = vld [vmem:[%s3907_s12 + $0x20] sm:$0xff]  }
 0x1a4   : > { %1293 = vst.msk [vmem:[#allocation3 + $0x51] sm:$0xff] %vm1289_vm0, %v1283_v47  ;;  %v1281_v48 = vsel %vm1241_vm4, %v1233_v14, %v2921_v46  ;;  %v3585_v47 = vld [vmem:[%s3902_s22 + $0x28] sm:$0xff]  }
 0x1a5   : > { %1291 = vst.msk [vmem:[#allocation3 + $0x31] sm:$0xff] %vm1289_vm0, %v1281_v48 }
 0x1a6   : > { %v3614_v49 = vpop.eup %3613 }
 0x1a7   : > { %v3616_v50 = vpop.eup %3615  ;;  %v2926_v51 = vadd.f32 -1.0, %v3614_v49 }
 0x1a8   : > { %v3618_v11 = vpop.eup %3617  ;;  %v2924_v52 = vadd.f32 -1.0, %v3616_v50 }
 0x1a9   : > { %v3620_v53 = vpop.eup %3619  ;;  %v1286_v54 = vsel %vm1246_vm5, %v1238_v22, %v2926_v51  ;;  %v2927_v55 = vadd.f32 -1.0, %v3618_v11  ;;  %v4109_v59 = vld [vmem:[#allocation3 + $0x40] sm:$0xff]  ;;  %v3587_v51 = vld [vmem:[%s3902_s22 + $0x30] sm:$0xff]   ;;  %s3661_s22 = scalar_lea.vmem %s4337_s19, 1024 }
 0x1aa   : > { %1296 = vst.msk [vmem:[#allocation3 + $0x81] sm:$0xff] %vm1289_vm0, %v1286_v54  ;;  %v1284_v56 = vsel %vm1244_vm6, %v1236_v24, %v2924_v52  ;;  %v2925_v57 = vadd.f32 -1.0, %v3620_v53  ;;  %v4118_v5 = vld [vmem:[#allocation3 + $0x21] sm:$0xff]  ;;  %v3588_v53 = vld [vmem:[%s3907_s12 + $0x30] sm:$0xff]   ;;  %p3662_p1 = scmp.ne.s32.totalorder %s4337_s19, %s3661_s22 }
 0x1ab   : > { %1294 = vst.msk [vmem:[#allocation3 + $0x61] sm:$0xff] %vm1289_vm0, %v1284_v56  ;;  %v1287_v58 = vsel %vm1247_vm8, %v1239_v27, %v2927_v55  ;;  %v4111_v60 = vld [vmem:[#allocation3 + $0x50] sm:$0xff]  ;;  %v1318_v9 = vld [vmem:[#allocation3 + $0x41] sm:$0xff]  ;;  %v2025_v46 = vpack.c.bf16 %v4118_v5, %v4078_v61 }
 0x1ac   : > { %v1319_v62 = vld [vmem:[#allocation3 + $0x51] sm:$0xff]  ;;  %1297 = vst.msk [vmem:[#allocation3 + $0x91] sm:$0xff] %vm1289_vm0, %v1287_v58  ;;  %v1285_v3 = vsel %vm1245_vm9, %v1237_v30, %v2925_v57  ;;  %v4116_v4 = vpack.c.bf16 %v4111_v60, %v4109_v59  ;;  %v1644_v10 = vld [vmem:[#allocation3 + $0x42] sm:$0xff]  ;;  %p3663_p2 = pnand %p3662_p1, %p3850_p3 }
 0x1ad   : > { %v1317_v6 = vld [vmem:[#allocation3 + $0x31] sm:$0xff]  ;;  %1295 = vst.msk [vmem:[#allocation3 + $0x71] sm:$0xff] %vm1289_vm0, %v1285_v3  ;;  %v1324_v13 = vpack.c.bf16 %v1319_v62, %v1318_v9  ;;  %v4152_v29 = vld [vmem:[#allocation3 + $0x22] sm:$0xff] }
 0x1ae   : > { %v1643_v7 = vld [vmem:[#allocation3 + $0x32] sm:$0xff]  ;;  %v1323_v8 = vpack.c.bf16 %v1317_v6, %v4118_v5  ;;  %3242 = vmatprep.mubr.msk.bf16.mxu1 %vm1289_vm0, %v4116_v4  ;;  %v4125_v14 = vpack.c.bf16 %v1318_v9, %v1317_v6  ;;  %v1300_v37 = vld [vmem:[#allocation3 + $0x20] sm:$0xff]  ;;  %v3586_v61 = vld [vmem:[%s3907_s12 + $0x28] sm:$0xff]   ;;  %v2213_v50 = vpack.c.bf16 %v4152_v29, %v4132_v20  ;;  %p3664_p4 = pneg %p3663_p2  ;;  %s3667_s12 = scalar_lea.vmem %s3666_s9, 2048 }
 0x1af   : > { %v4127_v15 = vpack.c.bf16 %v1644_v10, %v1643_v7  ;;  %v1645_v18 = vld [vmem:[#allocation3 + $0x52] sm:$0xff]  ;;  %v1649_v30 = vpack.c.bf16 %v1643_v7, %v4152_v29  ;;  %v1837_v40 = vpack.c.bf16 %v1300_v37, %v1299_v33  ;;  %p3669_p6 = scmp.lt.s32.totalorder %s3667_s12, %s3661_s22 }
 0x1b0   : > { %3209 = vmatmul.mubr.msk.bf16.vlgmr.msra.gmra.mrb[8].mxu0 %vm1289_vm0, %v1323_v8  ;;  %v1650_v32 = vpack.c.bf16 %v1645_v18, %v1644_v10  ;;  %v1301_v36 = vld [vmem:[#allocation3 + $0x30] sm:$0xff] }
 0x1b1   : > { %3212 = vmatprep.mubr.msk.bf16.mxu0 %vm1289_vm0, %v1324_v13  ;;  %3217 = vmatpush3.bf16.msra.mxu0 %v4095_v2  ;;  %v1648_v2 = vpack.c.bf16 %v4132_v20, %v1640_v16  ;;  %v4168_v38 = vpack.c.bf16 %v1301_v36, %v1300_v37  ;;  %v1838_v41 = vpack.c.bf16 %v4109_v59, %v1301_v36  ;;  %v2024_v48 = vld [vmem:[#allocation3 + $0x81] sm:$0xff]  ;;  %p3670_p7 = por %p3669_p6, %p3668_p5 }
 0x1b2   : > { %3226 = vmatprep.subr.bf16.mxu0 %v3580_v12  ;;  %v1320_v17 = vld [vmem:[#allocation3 + $0x61] sm:$0xff] }
 0x1b3   : > { %v1646_v19 = vld [vmem:[#allocation3 + $0x62] sm:$0xff]  ;;  %v4134_v21 = vpack.c.bf16 %v1320_v17, %v1319_v62  ;;  %v2400_v54 = vld [vmem:[#allocation3 + $0x90] sm:$0xff]  ;;  %p3671_p8 = pnand %p3670_p7, %p3664_p4 }
 0x1b4   : > { %v4136_v22 = vpack.c.bf16 %v1646_v19, %v1645_v18  ;;  %v4138_v23 = vld [vmem:[#allocation3 + $0x71] sm:$0xff]  ;;  %v1304_v24 = vld [vmem:[#allocation3 + $0x60] sm:$0xff] }
 0x1b5   : > { %v1305_v25 = vld [vmem:[#allocation3 + $0x70] sm:$0xff]  ;;  %v1325_v26 = vpack.c.bf16 %v4138_v23, %v1320_v17  ;;  %v1839_v43 = vpack.c.bf16 %v1304_v24, %v4111_v60  ;;  %v2028_v49 = vpack.c.bf16 %v2024_v48, %v4138_v23  ;;  %v2212_v11 = vld [vmem:[#allocation3 + $0x82] sm:$0xff] }
 0x1b6   : > { %v4141_v27 = vpack.c.bf16 %v1305_v25, %v1304_v24 }
 0x1b8   : > { %3213 = vmatmul.mubr.msk.bf16.gmra.mrb[12].mxu0 %vm1289_vm0, %v1325_v26  ;;  %3243 = vmatmul.mubr.msk.bf16.vlgmr.msra.gmra.mrb[0].mxu1 %vm1289_vm0, %v4141_v27 }
 0x1b9   : > { %3247 = vmatpush3.bf16.msra.mxu1 %v4089_v1  ;;  %3218 = vmatprep.mubr.msk.bf16.mxu0 %vm1289_vm0, %v4081_v63  ;;  %v1298_v63 = vld [vmem:[#allocation3] sm:$0xff]  ;;  %v4160_v1 = vld [vmem:[#allocation3 + $0x72] sm:$0xff] }
 0x1ba   : > { %3248 = vmatprep.mubr.msk.bf16.mxu1 %vm1289_vm0, %v1648_v2  ;;  %3256 = vmatprep.subr.bf16.mxu1 %v3579_v28  ;;  %v1306_v34 = vpack.c.bf16 %v1299_v33, %v1298_v63  ;;  %v1651_v35 = vpack.c.bf16 %v4160_v1, %v1646_v19  ;;  %v2216_v52 = vpack.c.bf16 %v2212_v11, %v4160_v1 }
 0x1c0   : > { %3219 = vmatmul.mubr.msk.bf16.vlgmr.msra.gmra.mrb[16].mxu0 %vm1289_vm0, %v1323_v8  ;;  %3249 = vmatmul.mubr.msk.bf16.vlgmr.msra.gmra.mrb[4].mxu1 %vm1289_vm0, %v1649_v30 }
 0x1c1   : > { %3257 = vmatpush3.bf16.msra.mxu1 %v3579_v28  ;;  %3222 = vmatprep.mubr.msk.bf16.mxu0 %vm1289_vm0, %v1324_v13 }
 0x1c2   : > { %3252 = vmatprep.mubr.msk.bf16.mxu1 %vm1289_vm0, %v1650_v32  ;;  %3227 = vmatpush3.bf16.msra.mxu0 %v3580_v12 }
 0x1c3   : > { %3266 = vmatprep.subr.bf16.mxu1 %v3581_v31  ;;  %3236 = vmatprep.subr.bf16.mxu0 %v4086_v0 }
 0x1c8   : > { %3223 = vmatmul.mubr.msk.bf16.gmra.mrb[20].mxu0 %vm1289_vm0, %v1325_v26  ;;  %3253 = vmatmul.mubr.msk.bf16.gmra.mrb[8].mxu1 %vm1289_vm0, %v1651_v35 }
 0x1c9   : > { %3228 = vmatprep.mubr.msk.bf16.mxu0 %vm1289_vm0, %v1306_v34  ;;  %3258 = vmatprep.mubr.msk.bf16.mxu1 %vm1289_vm0, %v1648_v2 }
 0x1d0   : > { %3229 = vmatmul.mubr.msk.bf16.vlgmr.msra.gmra.mrb[8].mxu0 %vm1289_vm0, %v4168_v38  ;;  %3259 = vmatmul.mubr.msk.bf16.vlgmr.msra.gmra.mrb[12].mxu1 %vm1289_vm0, %v1649_v30  ;;  %v3023_v30 = vld [vmem:[%s390_s29] ss:$0 sm:$0xff] }
 0x1d1   : > { %3267 = vmatpush3.bf16.msra.mxu1 %v3581_v31  ;;  %3232 = vmatprep.mubr.msk.bf16.mxu0 %vm1289_vm0, %v4116_v4 }
 0x1d2   : > { %3262 = vmatprep.mubr.msk.bf16.mxu1 %vm1289_vm0, %v1650_v32  ;;  %3237 = vmatpush3.bf16.msra.mxu0 %v4086_v0  ;;  %v1836_v0 = vld [vmem:[#allocation3 + $0x80] sm:$0xff] }
 0x1d3   : > { %3276 = vmatprep.subr.bf16.mxu1 %v3582_v39  ;;  %v1840_v44 = vpack.c.bf16 %v1836_v0, %v1305_v25  ;;  %v2404_v55 = vpack.c.bf16 %v2400_v54, %v1836_v0 }
 0x1d8   : > { %3233 = vmatmul.mubr.msk.bf16.gmra.mrb[12].mxu0 %vm1289_vm0, %v4141_v27  ;;  %3263 = vmatmul.mubr.msk.bf16.gmra.mrb[0].mxu1 %vm1289_vm0, %v1651_v35 }
 0x1d9   : > { %3268 = vmatprep.mubr.msk.bf16.mxu1 %vm1289_vm0, %v1837_v40  ;;  %3238 = vmatprep.mubr.msk.bf16.mxu0 %vm1289_vm0, %v1306_v34 }
 0x1e0   : > { %3239 = vmatmul.mubr.msk.bf16.vlgmr.msra.gmra.mrb[16].mxu0 %vm1289_vm0, %v4168_v38  ;;  %3269 = vmatmul.mubr.msk.bf16.vlgmr.msra.gmra.mrb[4].mxu1 %vm1289_vm0, %v1838_v41 }
 0x1e1   : > { %3277 = vmatpush3.bf16.msra.mxu1 %v3582_v39  ;;  %3272 = vmatprep.mubr.msk.bf16.mxu1 %vm1289_vm0, %v1839_v43 }
 0x1e2   : > { %3286 = vmatprep.subr.bf16.mxu1 %v3583_v42 }
 0x1e8   : > { %3273 = vmatmul.mubr.msk.bf16.gmra.mrb[8].mxu1 %vm1289_vm0, %v1840_v44 }
 0x1e9   : > { %3278 = vmatprep.mubr.msk.bf16.mxu1 %vm1289_vm0, %v1837_v40 }
 0x1f0   : > { %3279 = vmatmul.mubr.msk.bf16.vlgmr.msra.gmra.mrb[12].mxu1 %vm1289_vm0, %v1838_v41 }
 0x1f1   : > { %3287 = vmatpush3.bf16.msra.mxu1 %v3583_v42  ;;  %3282 = vmatprep.mubr.msk.bf16.mxu1 %vm1289_vm0, %v1839_v43 }
 0x1f2   : > { %3296 = vmatprep.subr.bf16.mxu1 %v3584_v45 }
 0x1f8   : > { %3283 = vmatmul.mubr.msk.bf16.gmra.mrb[0].mxu1 %vm1289_vm0, %v1840_v44 }
 0x1f9   : > { %3288 = vmatprep.mubr.msk.bf16.mxu1 %vm1289_vm0, %v2025_v46 }
 0x200   : > { %3289 = vmatmul.mubr.msk.bf16.vlgmr.msra.gmra.mrb[4].mxu1 %vm1289_vm0, %v4125_v14 }
 0x201   : > { %3297 = vmatpush3.bf16.msra.mxu1 %v3584_v45  ;;  %3292 = vmatprep.mubr.msk.bf16.mxu1 %vm1289_vm0, %v4134_v21 }
 0x202   : > { %3306 = vmatprep.subr.bf16.mxu1 %v3585_v47 }
 0x208   : > { %3293 = vmatmul.mubr.msk.bf16.gmra.mrb[8].mxu1 %vm1289_vm0, %v2028_v49 }
 0x209   : > { %3298 = vmatprep.mubr.msk.bf16.mxu1 %vm1289_vm0, %v2025_v46 }
 0x210   : > { %3299 = vmatmul.mubr.msk.bf16.vlgmr.msra.gmra.mrb[12].mxu1 %vm1289_vm0, %v4125_v14 }
 0x211   : > { %3307 = vmatpush3.bf16.msra.mxu1 %v3585_v47  ;;  %3302 = vmatprep.mubr.msk.bf16.mxu1 %vm1289_vm0, %v4134_v21 }
 0x212   : > { %3316 = vmatprep.subr.bf16.mxu1 %v3586_v61 }
 0x218   : > { %3303 = vmatmul.mubr.msk.bf16.gmra.mrb[0].mxu1 %vm1289_vm0, %v2028_v49 }
 0x219   : > { %3308 = vmatprep.mubr.msk.bf16.mxu1 %vm1289_vm0, %v2213_v50 }
 0x220   : > { %3309 = vmatmul.mubr.msk.bf16.vlgmr.msra.gmra.mrb[4].mxu1 %vm1289_vm0, %v4127_v15 }
 0x221   : > { %3317 = vmatpush3.bf16.msra.mxu1 %v3586_v61  ;;  %3312 = vmatprep.mubr.msk.bf16.mxu1 %vm1289_vm0, %v4136_v22 }
 0x222   : > { %3326 = vmatprep.subr.bf16.mxu1 %v3587_v51 }
 0x228   : > { %3313 = vmatmul.mubr.msk.bf16.gmra.mrb[8].mxu1 %vm1289_vm0, %v2216_v52 }
 0x229   : > { %3318 = vmatprep.mubr.msk.bf16.mxu1 %vm1289_vm0, %v2213_v50 }
 0x230   : > { %3319 = vmatmul.mubr.msk.bf16.vlgmr.msra.gmra.mrb[12].mxu1 %vm1289_vm0, %v4127_v15 }
 0x231   : > { %3327 = vmatpush3.bf16.msra.mxu1 %v3587_v51  ;;  %3322 = vmatprep.mubr.msk.bf16.mxu1 %vm1289_vm0, %v4136_v22 }
 0x232   : > { %3336 = vmatprep.subr.bf16.mxu1 %v3588_v53 }
 0x238   : > { %3323 = vmatmul.mubr.msk.bf16.gmra.mrb[0].mxu1 %vm1289_vm0, %v2216_v52 }
 0x239   : > { %3328 = vmatprep.mubr.msk.bf16.mxu1 %vm1289_vm0, %v4168_v38 }
 0x240   : > { %3329 = vmatmul.mubr.msk.bf16.vlgmr.msra.gmra.mrb[4].mxu1 %vm1289_vm0, %v4116_v4 }
 0x241   : > { %3337 = vmatpush3.bf16.msra.mxu1 %v3588_v53  ;;  %3332 = vmatprep.mubr.msk.bf16.mxu1 %vm1289_vm0, %v4141_v27 }
 0x248   : > { %3333 = vmatmul.mubr.msk.bf16.gmra.mrb[8].mxu1 %vm1289_vm0, %v2404_v55 }
 0x249   : > { %3338 = vmatprep.mubr.msk.bf16.mxu1 %vm1289_vm0, %v4168_v38 }
 0x250   : > { %3339 = vmatmul.mubr.msk.bf16.vlgmr.msra.gmra.mrb[12].mxu1 %vm1289_vm0, %v4116_v4 }
 0x251   : > { %3342 = vmatprep.mubr.msk.bf16.mxu1 %vm1289_vm0, %v4141_v27 }
 0x258   : > { %3343 = vmatmul.mubr.msk.bf16.gmra.mrb[0].mxu1 %vm1289_vm0, %v2404_v55 }
 0x29b   : > { %v3224_v56 = vpop.f32.mrb[20].mxu0 }
 0x29c   : > { %v1471_v57 = vpop.f32.mrb[21].mxu0 }
 0x29d   : > { %v3225_v58 = vpop.f32.mrb[22].mxu0 }
 0x29e   : > { %v4244_v59 = vpop.f32.mrb[23].mxu0 }
 0x2a3   : > { %v3230_v60 = vpop.f32.mrb[8].mxu0 }
 0x2a4   : > { %v1538_v62 = vpop.f32.mrb[9].mxu0 }
 0x2a5   : > { %v3231_v3 = vpop.f32.mrb[10].mxu0 }
 0x2a6   : > { %v1541_v5 = vpop.f32.mrb[11].mxu0 }
 0x2ab   : > { %v3234_v6 = vpop.f32.mrb[12].mxu0 }
 0x2ac   : > { %v1554_v7 = vpop.f32.mrb[13].mxu0 }
 0x2ad   : > { %v3235_v8 = vpop.f32.mrb[14].mxu0 }
 0x2ae   : > { %v1557_v9 = vpop.f32.mrb[15].mxu0 }
 0x2b3   : > { %v3240_v10 = vpop.f32.mrb[16].mxu0 }
 0x2b4   : > { %v1609_v4 = vpop.f32.mrb[17].mxu0 }
 0x2b5   : > { %v3241_v12 = vpop.f32.mrb[18].mxu0 }
 0x2b6   : > { %v1612_v13 = vpop.f32.mrb[19].mxu0 }
 0x313   : > { %v3330_v14 = vpop.f32.mrb[4].mxu1 }
 0x314   : > { %v4246_v15 = vadd.f32 %v3330_v14, %v3230_v60  ;;  %v2460_v16 = vpop.f32.mrb[5].mxu1 }
 0x315   : > { %v4248_v17 = vadd.f32 %v2460_v16, %v1538_v62  ;;  %v3331_v18 = vpop.f32.mrb[6].mxu1 }
 0x316   : > { %v4250_v19 = vadd.f32 %v3331_v18, %v3231_v3  ;;  %v2463_v20 = vpop.f32.mrb[7].mxu1 }
 0x317   : > { %v4252_v21 = vadd.f32 %v2463_v20, %v1541_v5 }
 0x31b   : > { %v3334_v22 = vpop.f32.mrb[8].mxu1 }
 0x31c   : > { %v4254_v23 = vadd.f32 %v3334_v22, %v3234_v6  ;;  %v2476_v24 = vpop.f32.mrb[9].mxu1 }
 0x31d   : > { %v4256_v25 = vadd.f32 %v2476_v24, %v1554_v7  ;;  %v3335_v26 = vpop.f32.mrb[10].mxu1 }
 0x31e   : > { %v4258_v27 = vadd.f32 %v3335_v26, %v3235_v8  ;;  %v2479_v2 = vpop.f32.mrb[11].mxu1 }
 0x31f   : > { %v4260_v28 = vadd.f32 %v2479_v2, %v1557_v9 }
 0x323   : > { %v3340_v29 = vpop.f32.mrb[12].mxu1 }
 0x324   : > { %v3356_v31 = vadd.f32 %v3340_v29, %v3240_v10  ;;  %v2534_v32 = vpop.f32.mrb[13].mxu1 }
 0x325   : > { %v3357_v63 = vadd.f32 %v2534_v32, %v1609_v4  ;;  %v3341_v1 = vpop.f32.mrb[14].mxu1 }
 0x326   : > { %v4267_v33 = vadd.f32 %v3356_v31, %v3023_v30  ;;  %v3358_v34 = vadd.f32 %v3341_v1, %v3241_v12  ;;  %v2537_v35 = vpop.f32.mrb[15].mxu1 }
 0x327   : > { %v4269_v36 = vadd.f32 %v3357_v63, %v3023_v30  ;;  %v3359_v37 = vadd.f32 %v2537_v35, %v1612_v13 }
 0x328   : > { %v2613_v38 = vand.u32 2147483647, %v4267_v33  ;;  %v4272_v39 = vadd.f32 %v3358_v34, %v3023_v30  ;;  %vm2645_vm10 = vcmp.ge.f32.partialorder %v4267_v33, 0.0 }
 0x329   : > { %v2611_v40 = vand.u32 2147483647, %v4269_v36  ;;  %v4275_v41 = vadd.f32 %v3359_v37, %v3023_v30  ;;  %v3022_v37 = vld [vmem:[%s382_s20] ss:$0 sm:$0xff]  ;;  %vm2643_vm11 = vcmp.ge.f32.partialorder %v4269_v36, 0.0  ;;  %s4348_s20 = scalar_lea.sflag [#allocation5], %s4429_s15 }
 0x32a   : > { %v2621_v42 = vsub.f32 0.0, %v2613_v38  ;;  %v2614_v43 = vand.u32 2147483647, %v4272_v39  ;;  %vm2646_vm12 = vcmp.ge.f32.partialorder %v4272_v39, 0.0  ;;  %v3655_v39 = vld [vmem:[%s3913_s30 + $0x18] sm:$0xff] }
 0x32b   : > { %v2619_v0 = vsub.f32 0.0, %v2611_v40  ;;  %v2612_v44 = vand.u32 2147483647, %v4275_v41  ;;  %v3344_v45 = vpop.f32.mrb[0].mxu1  ;;  %vm2644_vm13 = vcmp.ge.f32.partialorder %v4275_v41, 0.0 }
 0x32c   : > { %v2631_v46 = vmul.f32 1.442695, %v2621_v42  ;;  %v2622_v47 = vsub.f32 0.0, %v2614_v43  ;;  %v3360_v48 = vadd.f32 %v3344_v45, %v3224_v56  ;;  %v2550_v49 = vpop.f32.mrb[1].mxu1  ;;  %v2588_v45 = vadd.f32 %v4248_v17, %v3022_v37 }
 0x32d   : > { %v2627_v61 = vmul.f32 1.442695, %v2619_v0  ;;  %v2620_v50 = vsub.f32 0.0, %v2612_v44  ;;  %v3361_v51 = vadd.f32 %v2550_v49, %v1471_v57  ;;  %v3345_v11 = vpop.f32.mrb[2].mxu1  ;;  %v2590_v44 = vadd.f32 %v4246_v15, %v3022_v37 }
 0x32e   : > { %3621 = vpow2.f32 %v2631_v46  ;;  %v2633_v52 = vmul.f32 1.442695, %v2622_v47  ;;  %v4279_v53 = vadd.f32 %v3360_v48, %v3023_v30  ;;  %v3362_v54 = vadd.f32 %v3345_v11, %v3225_v58  ;;  %v2553_v55 = vpop.f32.mrb[3].mxu1 }
 0x32f   : > { %3623 = vpow2.f32 %v2627_v61  ;;  %v2629_v60 = vmul.f32 1.442695, %v2620_v50  ;;  %v4281_v62 = vadd.f32 %v3361_v51, %v3023_v30  ;;  %v3363_v3 = vadd.f32 %v2553_v55, %v4244_v59  ;;  %v3654_v55 = vld [vmem:[%s3913_s30] sm:$0xff] }
 0x330   : > { %3625 = vpow2.f32 %v2633_v52  ;;  %v2617_v56 = vand.u32 2147483647, %v4279_v53  ;;  %v4285_v5 = vadd.f32 %v3362_v54, %v3023_v30  ;;  %v2591_v48 = vadd.f32 %v4250_v19, %v3022_v37  ;;  %v3653_v19 = vld [vmem:[%s3913_s30 + $0x10] sm:$0xff] }
 0x331   : > { %3627 = vpow2.f32 %v2629_v60  ;;  %v2615_v57 = vand.u32 2147483647, %v4281_v62  ;;  %v4288_v6 = vadd.f32 %v3363_v3, %v3023_v30  ;;  %v2589_v17 = vadd.f32 %v4252_v21, %v3022_v37 }
 0x332   : > { %v2625_v7 = vsub.f32 0.0, %v2617_v56  ;;  %v2618_v58 = vand.u32 2147483647, %v4285_v5  ;;  %vm2649_vm14 = vcmp.ge.f32.partialorder %v4279_v53, 0.0  ;;  %vm2647_vm15 = vcmp.ge.f32.partialorder %v4281_v62, 0.0 }
 0x333   : > { %v2623_v8 = vsub.f32 0.0, %v2615_v57  ;;  %v2616_v9 = vand.u32 2147483647, %v4288_v6  ;;  %vm2650_vm0 = vcmp.ge.f32.partialorder %v4285_v5, 0.0  ;;  %vm2648_vm1 = vcmp.ge.f32.partialorder %v4288_v6, 0.0  ;;  %v3658_v5 = vld [vmem:[%s3913_s30 + $0x20] sm:$0xff] }
 0x334   : > { %v2639_v10 = vmul.f32 1.442695, %v2625_v7  ;;  %v2626_v4 = vsub.f32 0.0, %v2618_v58  ;;  %v3656_v7 = vld [vmem:[%s3913_s30 + $0x8] sm:$0xff] }
 0x335   : > { %v2635_v12 = vmul.f32 1.442695, %v2623_v8  ;;  %v2624_v59 = vsub.f32 0.0, %v2616_v9  ;;  %v2594_v9 = vadd.f32 %v4254_v23, %v3022_v37  ;;  %v3660_v6 = vld [vmem:[%s3913_s30 + $0x28] sm:$0xff] }
 0x336   : > { %3629 = vpow2.f32 %v2639_v10  ;;  %v2641_v13 = vmul.f32 1.442695, %v2626_v4  ;;  %v2592_v10 = vadd.f32 %v4256_v25, %v3022_v37 }
 0x337   : > { %3631 = vpow2.f32 %v2635_v12  ;;  %v2637_v14 = vmul.f32 1.442695, %v2624_v59  ;;  %v2595_v59 = vadd.f32 %v4258_v27, %v3022_v37  ;;  %v3657_v27 = vld [vmem:[%s3913_s30 + $0x30] sm:$0xff] }
 0x338   : > { %v3622_v16 = vpop.eup %3621  ;;  %3633 = vpow2.f32 %v2641_v13 }
 0x339   : > { %v3624_v18 = vpop.eup %3623  ;;  %v2653_v20 = vadd.f32 1.0, %v3622_v16  ;;  %3635 = vpow2.f32 %v2637_v14 }
 0x33a   : > { %v3626_v22 = vpop.eup %3625  ;;  %v2651_v24 = vadd.f32 1.0, %v3624_v18 }
 0x33b   : > { %v3628_v26 = vpop.eup %3627  ;;  %3637 = vrcp.f32 %v2653_v20  ;;  %v2654_v2 = vadd.f32 1.0, %v3626_v22 }
 0x33c   : > { %3639 = vrcp.f32 %v2651_v24  ;;  %v2652_v29 = vadd.f32 1.0, %v3628_v26 }
 0x33d   : > { %3641 = vrcp.f32 %v2654_v2 }
 0x33e   : > { %3643 = vrcp.f32 %v2652_v29 }
 0x340   : > { %v3630_v30 = vpop.eup %3629 }
 0x341   : > { %v3632_v31 = vpop.eup %3631  ;;  %v2657_v32 = vadd.f32 1.0, %v3630_v30 }
 0x342   : > { %v3634_v63 = vpop.eup %3633  ;;  %v2655_v1 = vadd.f32 1.0, %v3632_v31 }
 0x343   : > { %v3636_v34 = vpop.eup %3635  ;;  %3645 = vrcp.f32 %v2657_v32  ;;  %v2658_v35 = vadd.f32 1.0, %v3634_v63 }
 0x344   : > { %3647 = vrcp.f32 %v2655_v1  ;;  %v2656_v38 = vadd.f32 1.0, %v3636_v34 }
 0x345   : > { %v3638_v40 = vpop.eup %3637  ;;  %3649 = vrcp.f32 %v2658_v35 }
 0x346   : > { %v3640_v42 = vpop.eup %3639  ;;  %v2677_v43 = vmul.f32 %v3638_v40, %v3622_v16  ;;  %3651 = vrcp.f32 %v2656_v38  ;;  %v2593_v16 = vadd.f32 %v4260_v28, %v3022_v37  ;;  %v3659_v28 = vld [vmem:[%s3913_s30 + $0x38] sm:$0xff] }
 0x347   : > { %v3642_v0 = vpop.eup %3641  ;;  %v2675_v46 = vmul.f32 %v3640_v42, %v3624_v18 }
 0x348   : > { %v3644_v47 = vpop.eup %3643  ;;  %v2685_v49 = vsel %vm2645_vm10, %v3638_v40, %v2677_v43  ;;  %v2678_v61 = vmul.f32 %v3642_v0, %v3626_v22 }
 0x349   : > { %v2693_v50 = vmul.f32 %v2685_v49, %v2590_v44  ;;  %v2683_v51 = vsel %vm2643_vm11, %v3640_v42, %v2675_v46  ;;  %v2676_v15 = vmul.f32 %v3644_v47, %v3628_v26 }
 0x34a   : > { %v2691_v33 = vmul.f32 %v2683_v51, %v2588_v45  ;;  %v2686_v11 = vsel %vm2646_vm12, %v3642_v0, %v2678_v61 }
 0x34b   : > { %v2701_v52 = vadd.f32 %v3653_v19, %v2693_v50  ;;  %v2694_v54 = vmul.f32 %v2686_v11, %v2591_v48  ;;  %v2684_v36 = vsel %vm2644_vm13, %v3644_v47, %v2676_v15 }
 0x34c   : > { %v2699_v60 = vadd.f32 %v3654_v55, %v2691_v33  ;;  %v2692_v3 = vmul.f32 %v2684_v36, %v2589_v17 }
 0x34d   : > { %v3646_v56 = vpop.eup %3645  ;;  %2709 = vst.msk [vmem:[%s3913_s30 + $0x10] sm:$0xff] %vm517_vm7, %v2701_v52  ;;  %v2702_v21 = vadd.f32 %v3655_v39, %v2694_v54 }
 0x34e   : > { %v3648_v57 = vpop.eup %3647  ;;  %2707 = vst.msk [vmem:[%s3913_s30] sm:$0xff] %vm517_vm7, %v2699_v60  ;;  %v2700_v58 = vadd.f32 %v3656_v7, %v2692_v3  ;;  %v2681_v41 = vmul.f32 %v3646_v56, %v3630_v30 }
 0x34f   : > { %v3650_v8 = vpop.eup %3649  ;;  %2710 = vst.msk [vmem:[%s3913_s30 + $0x18] sm:$0xff] %vm517_vm7, %v2702_v21  ;;  %v2679_v4 = vmul.f32 %v3648_v57, %v3632_v31 }
 0x350   : > { %v3652_v12 = vpop.eup %3651  ;;  %2708 = vst.msk [vmem:[%s3913_s30 + $0x8] sm:$0xff] %vm517_vm7, %v2700_v58  ;;  %v2689_v13 = vsel %vm2649_vm14, %v3646_v56, %v2681_v41  ;;  %v2682_v23 = vmul.f32 %v3650_v8, %v3634_v63 }
 0x351   : > { %v2697_v14 = vmul.f32 %v2689_v13, %v2594_v9  ;;  %v2687_v25 = vsel %vm2647_vm15, %v3648_v57, %v2679_v4  ;;  %v2680_v53 = vmul.f32 %v3652_v12, %v3636_v34 }
 0x352   : > { %v2695_v18 = vmul.f32 %v2687_v25, %v2592_v10  ;;  %v2690_v20 = vsel %vm2650_vm0, %v3650_v8, %v2682_v23 }
 0x353   : > { %v2705_v62 = vadd.f32 %v3657_v27, %v2697_v14  ;;  %v2698_v22 = vmul.f32 %v2690_v20, %v2595_v59  ;;  %v2688_v24 = vsel %vm2648_vm1, %v3652_v12, %v2680_v53 }
 0x354   : > { %v2703_v26 = vadd.f32 %v3658_v5, %v2695_v18  ;;  %v2696_v2 = vmul.f32 %v2688_v24, %v2593_v16 }
 0x355   : > { %2713 = vst.msk [vmem:[%s3913_s30 + $0x30] sm:$0xff] %vm517_vm7, %v2705_v62  ;;  %v2706_v29 = vadd.f32 %v3659_v28, %v2698_v22 }
 0x356   : > { %2711 = vst.msk [vmem:[%s3913_s30 + $0x20] sm:$0xff] %vm517_vm7, %v2703_v26  ;;  %v2704_v30 = vadd.f32 %v3660_v6, %v2696_v2 }
 0x357   : > { %2714 = vst.msk [vmem:[%s3913_s30 + $0x38] sm:$0xff] %vm517_vm7, %v2706_v29 }
 0x358   : > { %2712 = vst.msk [vmem:[%s3913_s30 + $0x28] sm:$0xff] %vm517_vm7, %v2704_v30 }
 0x359   : > { %3674 = shalt.err (!%p3671_p8)
}
 0x35a   : > { %s3675_s16 = scalar_lea.hbm %s4335_s28, 1024  ;;  %s3679_s24 = scalar_lea.hbm %s4407_s7, 2048 }
 0x35b   : > { %p3676_p10 = scmp.ne.s32.totalorder %s4335_s28, %s3675_s16  ;;  %p3680_p13 = scmp.lt.u32.totalorder %s4335_s28, %s4407_s7 }
 0x35c   : > { %p3681_p0 = scmp.lt.u32.totalorder %s3679_s24, %s3675_s16  ;;  %p3683_p2 = scmp.lt.u32.totalorder %s3675_s16, %s4335_s28 }
 0x35d   : > { %p3677_p11 = pnand %p3676_p10, %p3850_p3 }
 0x35e   : > { %p3682_p1 = por %p3681_p0, %p3680_p13 }
 0x35f   : > { %p3678_p12 = pneg %p3677_p11 }
 0x360   : > { %p3684_p4 = por %p3683_p2, %p3682_p1 }
 0x362   : > { %p3685_p5 = pnand %p3684_p4, %p3678_p12 }
 0x364   : > { %3688 = shalt.err (!%p3685_p5)
}
 0x365   : > { %s3759_s8 = smov 128   ;;  %s3760_s11 = smov 8  }
 0x366   : > { %3501 = dma.vmem_to_hbm [thread:$0]  (%p3850_p3), %s4337_s19, 1024, %s4335_s28, %s4348_s20, %s3759_s8, %s3759_s8, %s3760_s11  }
 0x367 PF: > { %s4430_s14 = sld [smem:[#allocation11_spill]]  ;;  %s4431_s17 = sld [smem:[#allocation7_spill]] }
 0x36d   : > { %p3507_p6 = scmp.ge.s32.totalorder %s4430_s14, 2  ;;  %s2744_s21 = sand.u32 1, %s4431_s17  }
 0x36e   : > { %s2745_s10 = scalar_lea.sflag [#allocation5], %s2744_s21 }
 0x36f   : > { %p3504_p7 = pnand %p3507_p6, %p3860_p9 }
 0x371   : > { %3722 = dma.done.wait (!%p3504_p7), %s2745_s10, 1024  }
 0x372   : > { %3724 = vsyncadd (!%p3504_p7), %s2745_s10, 4294966272  ;;  %s20_s8 = sadd.s32 1, %s4430_s14   ;;  %s4433_s15 = sld [smem:[#allocation8_spill]] }
 0x373   : > { %p17_p8 = scmp.ge.s32.totalorder %s20_s8, 6   ;;  %s4434_s26 = sld [smem:[#allocation15_spill]] }
 0x374   : > { %s4435_s27 = sld [smem:[#allocation9_spill]]  ;;  %s4436_s28 = sld [smem:[#allocation10_spill]] }
 0x375   : > { %s4437_s29 = sld [smem:[#allocation12_spill]]  ;;  %s4438_s30 = sld [smem:[#allocation13_spill]] }
 0x376   : > { %s4439_s24 = smov %s3731_s25  ;;  %19 = sbr.rel (!%p17_p8) target bundleno = 5 (0x5), region = 129 }
 0x378   : > { %s4440_s25 = smov %s4433_s15 }
 0x37d   :  { %2750 = vsyncpa [#allocation5], 1 }
 0x37e   :  { %2752 = vsyncpa [#allocation5 + $0x1], 1 }

</bundles_post_ra>
